<compile_context>
chip_gen: v6e
topology: v6e:2x2x1
jax: 0.10.0
libtpu: 0.0.40
codegen_flags: <defaults>
</compile_context>

<pallas_src>
import functools

import jax
import jax.numpy as jnp
from jax import lax
from jax.experimental import pallas as pl
from jax.experimental.pallas import tpu as pltpu


# ----------------------------------------------------------------------------
# Fused decoder-layer kernel (all batches in one invocation, no grid)
# ----------------------------------------------------------------------------
def _decoder_layer_kernel(
    x_ref, mem_ref,
    w_qkv_s_ref, b_qkv_s_ref, w_o_s_ref, b_o_s_ref,
    w_q_c_ref, b_q_c_ref, w_kv_c_ref, b_kv_c_ref, w_o_c_ref, b_o_c_ref,
    w1_ref, b1_ref, w2_ref, b2_ref,
    g1_ref, be1_ref, g2_ref, be2_ref, g3_ref, be3_ref,
    o_ref,
    attn_ref,                      # VMEM scratch: (B*T, E) f32 head-merge buffer
    *, nbatch, tgt_len, mem_len, nhead, head_dim,
):
    E = nhead * head_dim
    f32 = jnp.float32
    bf16 = jnp.bfloat16

    def matmul(a_f32, w_ref):
        # bf16 operands on the MXU, f32 accumulation.
        return jnp.dot(a_f32.astype(bf16), w_ref[...], preferred_element_type=f32)

    def layer_norm(h, g_ref, b_ref):
        mu = jnp.mean(h, axis=-1, keepdims=True)
        c = h - mu
        var = jnp.mean(c * c, axis=-1, keepdims=True)
        return c * lax.rsqrt(var + 1e-5) * g_ref[...] + b_ref[...]

    def attention(q_src, q_off, kv_src, k_off, v_off, kv_rows, w_o_ref, b_o_ref):
        # Per-(batch, head) score / p@v matmuls.  Each head's output is stored into
        # attn_ref at its lane offset (head-merge is free), then the merged (B*T, E)
        # goes through ONE K=E out-projection matmul instead of nhead K=head_dim ones.
        for b in range(nbatch):
            r0 = b * tgt_len
            qb = q_src[r0:r0 + tgt_len, q_off:q_off + E].astype(bf16)          # (T, E)
            kvb = kv_src[b * kv_rows:(b + 1) * kv_rows, :].astype(bf16)        # (kv, *)
            # TODO(synk): for E >= 128, pad/reorder the fused QKV weights so each
            # head's columns start on a 128-lane boundary (avoids per-head relayouts).
            for h in range(nhead):
                qh = qb[:, h * head_dim:(h + 1) * head_dim]
                kh = kvb[:, k_off + h * head_dim:k_off + (h + 1) * head_dim]
                vh = kvb[:, v_off + h * head_dim:v_off + (h + 1) * head_dim]
                # scores = qh @ kh^T  (q already carries the 1/sqrt(head_dim) scale)
                s = lax.dot_general(qh, kh, (((1,), (1,)), ((), ())),
                                    preferred_element_type=f32)                # (T, kv)
                s = s - jnp.max(s, axis=-1, keepdims=True)
                p = jnp.exp(s)
                p = p * pl.reciprocal(jnp.sum(p, axis=-1, keepdims=True), approx=True)
                attn_ref[r0:r0 + tgt_len, h * head_dim:(h + 1) * head_dim] = (
                    jnp.dot(p.astype(bf16), vh, preferred_element_type=f32))   # (T, hd)
        return matmul(attn_ref[...], w_o_ref) + b_o_ref[...]                   # (B*T, E)

    x = x_ref[...]      # (B*T, E) f32, batch-major rows
    mem = mem_ref[...]  # (B*S, E) f32

    # ---- self attention (fused QKV projection, all rows at once) + add & norm ------
    qkv = matmul(x, w_qkv_s_ref) + b_qkv_s_ref[...]                            # (B*T, 3E)
    sa = attention(qkv, 0, qkv, E, 2 * E, tgt_len, w_o_s_ref, b_o_s_ref)
    x = layer_norm(x + sa, g1_ref, be1_ref)

    # ---- cross attention (fused KV projection of memory) + add & norm --------------
    q_c = matmul(x, w_q_c_ref) + b_q_c_ref[...]                                # (B*T, E)
    kv_c = matmul(mem, w_kv_c_ref) + b_kv_c_ref[...]                           # (B*S, 2E)
    ca = attention(q_c, 0, kv_c, 0, E, mem_len, w_o_c_ref, b_o_c_ref)
    x = layer_norm(x + ca, g2_ref, be2_ref)

    # ---- feed-forward (relu) + add & norm -------------------------------------------
    h = jnp.maximum(matmul(x, w1_ref) + b1_ref[...], 0.0)
    y = matmul(h, w2_ref) + b2_ref[...]
    x = layer_norm(x + y, g3_ref, be3_ref)

    # NOTE: with E >= 128 this store is naturally lane-dense; at E=32 it is a masked
    # store but only a few hundred bytes.
    o_ref[...] = x


# ----------------------------------------------------------------------------
# Wrapper: parameter fusion + single pallas_call (no grid)
# ----------------------------------------------------------------------------
@functools.partial(jax.jit, static_argnames=("nhead",))
def transformer_decoder_layer(tgt, memory, params, nhead):
    """tgt: (T, B, E), memory: (S, B, E) -> (T, B, E).  Dropout = identity (eval)."""
    T, B, E = tgt.shape
    S = memory.shape[0]
    hd = E // nhead
    scale = hd ** -0.5
    F = params["w1"].shape[1]
    bf16 = jnp.bfloat16

    sa, ca = params["self_attn"], params["cross_attn"]
    # Fold the softmax scale into the Q projection (weight AND bias); fuse QKV / KV.
    # Weights are pre-cast to bf16 (half the weight VMEM footprint and DMA bytes);
    # biases / LayerNorm params stay f32 (added to f32 accumulators).
    w_qkv_s = jnp.concatenate([sa["wq"] * scale, sa["wk"], sa["wv"]], axis=1).astype(bf16)
    b_qkv_s = jnp.concatenate([sa["bq"] * scale, sa["bk"], sa["bv"]]).reshape(1, 3 * E)
    w_q_c = (ca["wq"] * scale).astype(bf16)
    b_q_c = (ca["bq"] * scale).reshape(1, E)
    w_kv_c = jnp.concatenate([ca["wk"], ca["wv"]], axis=1).astype(bf16)
    b_kv_c = jnp.concatenate([ca["bk"], ca["bv"]]).reshape(1, 2 * E)

    # Batch folded into the matmul row axis (batch-major layout).
    x2d = jnp.transpose(tgt, (1, 0, 2)).reshape(B * T, E)
    m2d = jnp.transpose(memory, (1, 0, 2)).reshape(B * S, E)

    kernel = functools.partial(_decoder_layer_kernel, nbatch=B, tgt_len=T,
                               mem_len=S, nhead=nhead, head_dim=hd)

    # Whole arrays resident in VMEM; no grid => no pipelining => weights are
    # single-buffered and loaded exactly once.
    vmem = pl.BlockSpec(memory_space=pltpu.MemorySpace.VMEM)

    out2d = pl.pallas_call(
        kernel,
        out_shape=jax.ShapeDtypeStruct((B * T, E), jnp.float32),
        in_specs=[vmem] * 22,
        out_specs=vmem,
        scratch_shapes=[pltpu.VMEM((B * T, E), jnp.float32)],
        compiler_params=pltpu.CompilerParams(vmem_limit_bytes=32 * 1024 * 1024),
    )(
        x2d, m2d,
        w_qkv_s, b_qkv_s, sa["wo"].astype(bf16), sa["bo"].reshape(1, E),
        w_q_c, b_q_c, w_kv_c, b_kv_c, ca["wo"].astype(bf16), ca["bo"].reshape(1, E),
        params["w1"].astype(bf16), params["b1"].reshape(1, F),
        params["w2"].astype(bf16), params["b2"].reshape(1, E),
        params["norm1_g"].reshape(1, E), params["norm1_b"].reshape(1, E),
        params["norm2_g"].reshape(1, E), params["norm2_b"].reshape(1, E),
        params["norm3_g"].reshape(1, E), params["norm3_b"].reshape(1, E),
    )
    return jnp.transpose(out2d.reshape(B, T, E), (1, 0, 2))  # back to (T, B, E)


# ----------------------------------------------------------------------------
# Pure-JAX f32 reference (for correctness check)
# ----------------------------------------------------------------------------
def _ref_mha(query, key, value, p, nhead):
    L, B, E = query.shape
    S = key.shape[0]
    hd = E // nhead
    scale = hd ** -0.5
    q = query @ p["wq"] + p["bq"]
    k = key @ p["wk"] + p["bk"]
    v = value @ p["wv"] + p["bv"]
    q = q.reshape(L, B, nhead, hd).transpose(1, 2, 0, 3) * scale
    k = k.reshape(S, B, nhead, hd).transpose(1, 2, 0, 3)
    v = v.reshape(S, B, nhead, hd).transpose(1, 2, 0, 3)
    s = jnp.einsum("bhqd,bhkd->bhqk", q, k)
    a = jax.nn.softmax(s, axis=-1)
    o = jnp.einsum("bhqk,bhkd->bhqd", a, v)
    o = o.transpose(2, 0, 1, 3).reshape(L, B, E)
    return o @ p["wo"] + p["bo"]


def _ref_ln(x, g, b):
    mu = jnp.mean(x, axis=-1, keepdims=True)
    var = jnp.mean((x - mu) ** 2, axis=-1, keepdims=True)
    return (x - mu) * lax.rsqrt(var + 1e-5) * g + b


def _ref_layer(tgt, memory, params, nhead):
    t2 = _ref_mha(tgt, tgt, tgt, params["self_attn"], nhead)
    tgt = _ref_ln(tgt + t2, params["norm1_g"], params["norm1_b"])
    t2 = _ref_mha(tgt, memory, memory, params["cross_attn"], nhead)
    tgt = _ref_ln(tgt + t2, params["norm2_g"], params["norm2_b"])
    t2 = jnp.maximum(tgt @ params["w1"] + params["b1"], 0.0) @ params["w2"] + params["b2"]
    tgt = _ref_ln(tgt + t2, params["norm3_g"], params["norm3_b"])
    return tgt


# ----------------------------------------------------------------------------
def make_params(key, d_model, nhead, dim_feedforward):
    keys = jax.random.split(key, 16)
    it = iter(keys)

    def w(k, shape, scale=0.1):
        return (scale * jax.random.normal(k, shape)).astype(jnp.float32)

    def attn_params():
        return {
            "wq": w(next(it), (d_model, d_model)),
            "wk": w(next(it), (d_model, d_model)),
            "wv": w(next(it), (d_model, d_model)),
            "wo": w(next(it), (d_model, d_model)),
            "bq": jnp.zeros((d_model,), jnp.float32),
            "bk": jnp.zeros((d_model,), jnp.float32),
            "bv": jnp.zeros((d_model,), jnp.float32),
            "bo": jnp.zeros((d_model,), jnp.float32),
        }

    return {
        "self_attn": attn_params(),
        "cross_attn": attn_params(),
        "w1": w(next(it), (d_model, dim_feedforward)),
        "b1": w(next(it), (dim_feedforward,)),
        "w2": w(next(it), (dim_feedforward, d_model)),
        "b2": w(next(it), (d_model,)),
        "norm1_g": jnp.ones((d_model,), jnp.float32),
        "norm1_b": jnp.zeros((d_model,), jnp.float32),
        "norm2_g": jnp.ones((d_model,), jnp.float32),
        "norm2_b": jnp.zeros((d_model,), jnp.float32),
        "norm3_g": jnp.ones((d_model,), jnp.float32),
        "norm3_b": jnp.zeros((d_model,), jnp.float32),
    }


if __name__ == "__main__":
    d_model, nhead, dim_feedforward = 32, 4, 64
    T, S, B = 8, 10, 2  # tgt length, memory length, batch

    root = jax.random.PRNGKey(0)
    k_p, k_t, k_m = jax.random.split(root, 3)
    params = make_params(k_p, d_model, nhead, dim_feedforward)
    tgt = jax.random.normal(k_t, (T, B, d_model), jnp.float32)
    memory = jax.random.normal(k_m, (S, B, d_model), jnp.float32)

    out = transformer_decoder_layer(tgt, memory, params, nhead=nhead)
    out = jax.block_until_ready(out)

    ref = _ref_layer(tgt, memory, params, nhead)
    assert out.shape == (T, B, d_model)
    # Tolerance covers bf16 matmul operands (f32 accumulation) + EUP approx reciprocal
    # in the softmax, vs. an all-f32 reference.
    err = jnp.max(jnp.abs(out - ref))
    assert jnp.allclose(out, ref, atol=3e-2, rtol=3e-2), f"mismatch vs reference: {err}"

    print("KERNEL_OK")
</pallas_src>

<mosaic_0001>
module attributes {stable_mosaic.version = 11 : i64} {
  func.func @_decoder_layer_kernel(%arg0: memref<16x32xf32, #tpu.memory_space<vmem>>, %arg1: memref<20x32xf32, #tpu.memory_space<vmem>>, %arg2: memref<32x96xbf16, #tpu.memory_space<vmem>>, %arg3: memref<1x96xf32, #tpu.memory_space<vmem>>, %arg4: memref<32x32xbf16, #tpu.memory_space<vmem>>, %arg5: memref<1x32xf32, #tpu.memory_space<vmem>>, %arg6: memref<32x32xbf16, #tpu.memory_space<vmem>>, %arg7: memref<1x32xf32, #tpu.memory_space<vmem>>, %arg8: memref<32x64xbf16, #tpu.memory_space<vmem>>, %arg9: memref<1x64xf32, #tpu.memory_space<vmem>>, %arg10: memref<32x32xbf16, #tpu.memory_space<vmem>>, %arg11: memref<1x32xf32, #tpu.memory_space<vmem>>, %arg12: memref<32x64xbf16, #tpu.memory_space<vmem>>, %arg13: memref<1x64xf32, #tpu.memory_space<vmem>>, %arg14: memref<64x32xbf16, #tpu.memory_space<vmem>>, %arg15: memref<1x32xf32, #tpu.memory_space<vmem>>, %arg16: memref<1x32xf32, #tpu.memory_space<vmem>>, %arg17: memref<1x32xf32, #tpu.memory_space<vmem>>, %arg18: memref<1x32xf32, #tpu.memory_space<vmem>>, %arg19: memref<1x32xf32, #tpu.memory_space<vmem>>, %arg20: memref<1x32xf32, #tpu.memory_space<vmem>>, %arg21: memref<1x32xf32, #tpu.memory_space<vmem>>, %arg22: memref<16x32xf32, #tpu.memory_space<vmem>>, %arg23: memref<16x32xf32, #tpu.memory_space<vmem>>) attributes {dimension_semantics = [], scalar_prefetch = 0 : i64, scratch_operands = 1 : i64, tpu.core_type = #tpu.core_type<tc>} {
    %c0 = arith.constant 0 : index
    %c0_0 = arith.constant 0 : index
    %0 = vector.load %arg0[%c0, %c0_0] : memref<16x32xf32, #tpu.memory_space<vmem>>, vector<16x32xf32>
    %c0_1 = arith.constant 0 : index
    %c0_2 = arith.constant 0 : index
    %1 = vector.load %arg1[%c0_1, %c0_2] : memref<20x32xf32, #tpu.memory_space<vmem>>, vector<20x32xf32>
    %2 = arith.truncf %0 : vector<16x32xf32> to vector<16x32xbf16>
    %c0_3 = arith.constant 0 : index
    %c0_4 = arith.constant 0 : index
    %3 = vector.load %arg2[%c0_3, %c0_4] : memref<32x96xbf16, #tpu.memory_space<vmem>>, vector<32x96xbf16>
    %cst = arith.constant dense<0.000000e+00> : vector<16x96xf32>
    %4 = tpu.matmul %2, %3, %cst {dimension_numbers = #tpu.dot_dimension_numbers<[1], [0], [0], [1], [0, 0, 1, 1], [], []>} : vector<16x32xbf16>, vector<32x96xbf16>, vector<16x96xf32> -> vector<16x96xf32>
    %c0_5 = arith.constant 0 : index
    %c0_6 = arith.constant 0 : index
    %5 = vector.load %arg3[%c0_5, %c0_6] : memref<1x96xf32, #tpu.memory_space<vmem>>, vector<1x96xf32>
    %6 = vector.broadcast %5 : vector<1x96xf32> to vector<16x96xf32>
    %7 = arith.addf %4, %6 : vector<16x96xf32>
    %8 = vector.extract_strided_slice %7 {offsets = [0, 0], sizes = [8, 32], strides = [1, 1]} : vector<16x96xf32> to vector<8x32xf32>
    %9 = arith.truncf %8 : vector<8x32xf32> to vector<8x32xbf16>
    %10 = vector.extract_strided_slice %7 {offsets = [0, 0], sizes = [8, 96], strides = [1, 1]} : vector<16x96xf32> to vector<8x96xf32>
    %11 = arith.truncf %10 : vector<8x96xf32> to vector<8x96xbf16>
    %12 = vector.extract_strided_slice %9 {offsets = [0, 0], sizes = [8, 8], strides = [1, 1]} : vector<8x32xbf16> to vector<8x8xbf16>
    %13 = vector.extract_strided_slice %11 {offsets = [0, 32], sizes = [8, 8], strides = [1, 1]} : vector<8x96xbf16> to vector<8x8xbf16>
    %14 = vector.extract_strided_slice %11 {offsets = [0, 64], sizes = [8, 8], strides = [1, 1]} : vector<8x96xbf16> to vector<8x8xbf16>
    %cst_7 = arith.constant dense<0.000000e+00> : vector<8x8xf32>
    %15 = tpu.matmul %12, %13, %cst_7 {dimension_numbers = #tpu.dot_dimension_numbers<[1], [1], [0], [0], [0, 0, 1, 0], [], []>} : vector<8x8xbf16>, vector<8x8xbf16>, vector<8x8xf32> -> vector<8x8xf32>
    %cst_8 = arith.constant dense<0xFF800000> : vector<8xf32>
    %16 = vector.multi_reduction <maximumf>, %15, %cst_8 [1] : vector<8x8xf32> to vector<8xf32>
    %17 = vector.shape_cast %16 : vector<8xf32> to vector<8x1xf32>
    %18 = vector.broadcast %17 : vector<8x1xf32> to vector<8x8xf32>
    %19 = arith.subf %15, %18 : vector<8x8xf32>
    %20 = math.exp %19 : vector<8x8xf32>
    %cst_9 = arith.constant dense<0.000000e+00> : vector<8xf32>
    %21 = vector.multi_reduction <add>, %20, %cst_9 [1] : vector<8x8xf32> to vector<8xf32>
    %22 = vector.shape_cast %21 : vector<8xf32> to vector<8x1xf32>
    %23 = tpu.reciprocal %22 {approx = true} : vector<8x1xf32> -> vector<8x1xf32>
    %24 = vector.broadcast %23 : vector<8x1xf32> to vector<8x8xf32>
    %25 = arith.mulf %20, %24 : vector<8x8xf32>
    %26 = arith.truncf %25 : vector<8x8xf32> to vector<8x8xbf16>
    %cst_10 = arith.constant dense<0.000000e+00> : vector<8x8xf32>
    %27 = tpu.matmul %26, %14, %cst_10 {dimension_numbers = #tpu.dot_dimension_numbers<[1], [0], [0], [1], [0, 0, 1, 1], [], []>} : vector<8x8xbf16>, vector<8x8xbf16>, vector<8x8xf32> -> vector<8x8xf32>
    %c0_11 = arith.constant 0 : index
    %c0_12 = arith.constant 0 : index
    %28 = vector.load %arg23[%c0_11, %c0_12] : memref<16x32xf32, #tpu.memory_space<vmem>>, vector<8x8xf32>
    tpu.vector_store %arg23[%c0_11, %c0_12], %27 {strides = array<i32>} : memref<16x32xf32, #tpu.memory_space<vmem>>, vector<8x8xf32>,
    %29 = vector.extract_strided_slice %9 {offsets = [0, 8], sizes = [8, 8], strides = [1, 1]} : vector<8x32xbf16> to vector<8x8xbf16>
    %30 = vector.extract_strided_slice %11 {offsets = [0, 40], sizes = [8, 8], strides = [1, 1]} : vector<8x96xbf16> to vector<8x8xbf16>
    %31 = vector.extract_strided_slice %11 {offsets = [0, 72], sizes = [8, 8], strides = [1, 1]} : vector<8x96xbf16> to vector<8x8xbf16>
    %cst_13 = arith.constant dense<0.000000e+00> : vector<8x8xf32>
    %32 = tpu.matmul %29, %30, %cst_13 {dimension_numbers = #tpu.dot_dimension_numbers<[1], [1], [0], [0], [0, 0, 1, 0], [], []>} : vector<8x8xbf16>, vector<8x8xbf16>, vector<8x8xf32> -> vector<8x8xf32>
    %cst_14 = arith.constant dense<0xFF800000> : vector<8xf32>
    %33 = vector.multi_reduction <maximumf>, %32, %cst_14 [1] : vector<8x8xf32> to vector<8xf32>
    %34 = vector.shape_cast %33 : vector<8xf32> to vector<8x1xf32>
    %35 = vector.broadcast %34 : vector<8x1xf32> to vector<8x8xf32>
    %36 = arith.subf %32, %35 : vector<8x8xf32>
    %37 = math.exp %36 : vector<8x8xf32>
    %cst_15 = arith.constant dense<0.000000e+00> : vector<8xf32>
    %38 = vector.multi_reduction <add>, %37, %cst_15 [1] : vector<8x8xf32> to vector<8xf32>
    %39 = vector.shape_cast %38 : vector<8xf32> to vector<8x1xf32>
    %40 = tpu.reciprocal %39 {approx = true} : vector<8x1xf32> -> vector<8x1xf32>
    %41 = vector.broadcast %40 : vector<8x1xf32> to vector<8x8xf32>
    %42 = arith.mulf %37, %41 : vector<8x8xf32>
    %43 = arith.truncf %42 : vector<8x8xf32> to vector<8x8xbf16>
    %cst_16 = arith.constant dense<0.000000e+00> : vector<8x8xf32>
    %44 = tpu.matmul %43, %31, %cst_16 {dimension_numbers = #tpu.dot_dimension_numbers<[1], [0], [0], [1], [0, 0, 1, 1], [], []>} : vector<8x8xbf16>, vector<8x8xbf16>, vector<8x8xf32> -> vector<8x8xf32>
    %c0_17 = arith.constant 0 : index
    %c8 = arith.constant 8 : index
    %45 = vector.load %arg23[%c0_17, %c8] : memref<16x32xf32, #tpu.memory_space<vmem>>, vector<8x8xf32>
    tpu.vector_store %arg23[%c0_17, %c8], %44 {strides = array<i32>} : memref<16x32xf32, #tpu.memory_space<vmem>>, vector<8x8xf32>,
    %46 = vector.extract_strided_slice %9 {offsets = [0, 16], sizes = [8, 8], strides = [1, 1]} : vector<8x32xbf16> to vector<8x8xbf16>
    %47 = vector.extract_strided_slice %11 {offsets = [0, 48], sizes = [8, 8], strides = [1, 1]} : vector<8x96xbf16> to vector<8x8xbf16>
    %48 = vector.extract_strided_slice %11 {offsets = [0, 80], sizes = [8, 8], strides = [1, 1]} : vector<8x96xbf16> to vector<8x8xbf16>
    %cst_18 = arith.constant dense<0.000000e+00> : vector<8x8xf32>
    %49 = tpu.matmul %46, %47, %cst_18 {dimension_numbers = #tpu.dot_dimension_numbers<[1], [1], [0], [0], [0, 0, 1, 0], [], []>} : vector<8x8xbf16>, vector<8x8xbf16>, vector<8x8xf32> -> vector<8x8xf32>
    %cst_19 = arith.constant dense<0xFF800000> : vector<8xf32>
    %50 = vector.multi_reduction <maximumf>, %49, %cst_19 [1] : vector<8x8xf32> to vector<8xf32>
    %51 = vector.shape_cast %50 : vector<8xf32> to vector<8x1xf32>
    %52 = vector.broadcast %51 : vector<8x1xf32> to vector<8x8xf32>
    %53 = arith.subf %49, %52 : vector<8x8xf32>
    %54 = math.exp %53 : vector<8x8xf32>
    %cst_20 = arith.constant dense<0.000000e+00> : vector<8xf32>
    %55 = vector.multi_reduction <add>, %54, %cst_20 [1] : vector<8x8xf32> to vector<8xf32>
    %56 = vector.shape_cast %55 : vector<8xf32> to vector<8x1xf32>
    %57 = tpu.reciprocal %56 {approx = true} : vector<8x1xf32> -> vector<8x1xf32>
    %58 = vector.broadcast %57 : vector<8x1xf32> to vector<8x8xf32>
    %59 = arith.mulf %54, %58 : vector<8x8xf32>
    %60 = arith.truncf %59 : vector<8x8xf32> to vector<8x8xbf16>
    %cst_21 = arith.constant dense<0.000000e+00> : vector<8x8xf32>
    %61 = tpu.matmul %60, %48, %cst_21 {dimension_numbers = #tpu.dot_dimension_numbers<[1], [0], [0], [1], [0, 0, 1, 1], [], []>} : vector<8x8xbf16>, vector<8x8xbf16>, vector<8x8xf32> -> vector<8x8xf32>
    %c0_22 = arith.constant 0 : index
    %c16 = arith.constant 16 : index
    %62 = vector.load %arg23[%c0_22, %c16] : memref<16x32xf32, #tpu.memory_space<vmem>>, vector<8x8xf32>
    tpu.vector_store %arg23[%c0_22, %c16], %61 {strides = array<i32>} : memref<16x32xf32, #tpu.memory_space<vmem>>, vector<8x8xf32>,
    %63 = vector.extract_strided_slice %9 {offsets = [0, 24], sizes = [8, 8], strides = [1, 1]} : vector<8x32xbf16> to vector<8x8xbf16>
    %64 = vector.extract_strided_slice %11 {offsets = [0, 56], sizes = [8, 8], strides = [1, 1]} : vector<8x96xbf16> to vector<8x8xbf16>
    %65 = vector.extract_strided_slice %11 {offsets = [0, 88], sizes = [8, 8], strides = [1, 1]} : vector<8x96xbf16> to vector<8x8xbf16>
    %cst_23 = arith.constant dense<0.000000e+00> : vector<8x8xf32>
    %66 = tpu.matmul %63, %64, %cst_23 {dimension_numbers = #tpu.dot_dimension_numbers<[1], [1], [0], [0], [0, 0, 1, 0], [], []>} : vector<8x8xbf16>, vector<8x8xbf16>, vector<8x8xf32> -> vector<8x8xf32>
    %cst_24 = arith.constant dense<0xFF800000> : vector<8xf32>
    %67 = vector.multi_reduction <maximumf>, %66, %cst_24 [1] : vector<8x8xf32> to vector<8xf32>
    %68 = vector.shape_cast %67 : vector<8xf32> to vector<8x1xf32>
    %69 = vector.broadcast %68 : vector<8x1xf32> to vector<8x8xf32>
    %70 = arith.subf %66, %69 : vector<8x8xf32>
    %71 = math.exp %70 : vector<8x8xf32>
    %cst_25 = arith.constant dense<0.000000e+00> : vector<8xf32>
    %72 = vector.multi_reduction <add>, %71, %cst_25 [1] : vector<8x8xf32> to vector<8xf32>
    %73 = vector.shape_cast %72 : vector<8xf32> to vector<8x1xf32>
    %74 = tpu.reciprocal %73 {approx = true} : vector<8x1xf32> -> vector<8x1xf32>
    %75 = vector.broadcast %74 : vector<8x1xf32> to vector<8x8xf32>
    %76 = arith.mulf %71, %75 : vector<8x8xf32>
    %77 = arith.truncf %76 : vector<8x8xf32> to vector<8x8xbf16>
    %cst_26 = arith.constant dense<0.000000e+00> : vector<8x8xf32>
    %78 = tpu.matmul %77, %65, %cst_26 {dimension_numbers = #tpu.dot_dimension_numbers<[1], [0], [0], [1], [0, 0, 1, 1], [], []>} : vector<8x8xbf16>, vector<8x8xbf16>, vector<8x8xf32> -> vector<8x8xf32>
    %c0_27 = arith.constant 0 : index
    %c24 = arith.constant 24 : index
    %79 = vector.load %arg23[%c0_27, %c24] : memref<16x32xf32, #tpu.memory_space<vmem>>, vector<8x8xf32>
    tpu.vector_store %arg23[%c0_27, %c24], %78 {strides = array<i32>} : memref<16x32xf32, #tpu.memory_space<vmem>>, vector<8x8xf32>,
    %80 = vector.extract_strided_slice %7 {offsets = [8, 0], sizes = [8, 32], strides = [1, 1]} : vector<16x96xf32> to vector<8x32xf32>
    %81 = arith.truncf %80 : vector<8x32xf32> to vector<8x32xbf16>
    %82 = vector.extract_strided_slice %7 {offsets = [8, 0], sizes = [8, 96], strides = [1, 1]} : vector<16x96xf32> to vector<8x96xf32>
    %83 = arith.truncf %82 : vector<8x96xf32> to vector<8x96xbf16>
    %84 = vector.extract_strided_slice %81 {offsets = [0, 0], sizes = [8, 8], strides = [1, 1]} : vector<8x32xbf16> to vector<8x8xbf16>
    %85 = vector.extract_strided_slice %83 {offsets = [0, 32], sizes = [8, 8], strides = [1, 1]} : vector<8x96xbf16> to vector<8x8xbf16>
    %86 = vector.extract_strided_slice %83 {offsets = [0, 64], sizes = [8, 8], strides = [1, 1]} : vector<8x96xbf16> to vector<8x8xbf16>
    %cst_28 = arith.constant dense<0.000000e+00> : vector<8x8xf32>
    %87 = tpu.matmul %84, %85, %cst_28 {dimension_numbers = #tpu.dot_dimension_numbers<[1], [1], [0], [0], [0, 0, 1, 0], [], []>} : vector<8x8xbf16>, vector<8x8xbf16>, vector<8x8xf32> -> vector<8x8xf32>
    %cst_29 = arith.constant dense<0xFF800000> : vector<8xf32>
    %88 = vector.multi_reduction <maximumf>, %87, %cst_29 [1] : vector<8x8xf32> to vector<8xf32>
    %89 = vector.shape_cast %88 : vector<8xf32> to vector<8x1xf32>
    %90 = vector.broadcast %89 : vector<8x1xf32> to vector<8x8xf32>
    %91 = arith.subf %87, %90 : vector<8x8xf32>
    %92 = math.exp %91 : vector<8x8xf32>
    %cst_30 = arith.constant dense<0.000000e+00> : vector<8xf32>
    %93 = vector.multi_reduction <add>, %92, %cst_30 [1] : vector<8x8xf32> to vector<8xf32>
    %94 = vector.shape_cast %93 : vector<8xf32> to vector<8x1xf32>
    %95 = tpu.reciprocal %94 {approx = true} : vector<8x1xf32> -> vector<8x1xf32>
    %96 = vector.broadcast %95 : vector<8x1xf32> to vector<8x8xf32>
    %97 = arith.mulf %92, %96 : vector<8x8xf32>
    %98 = arith.truncf %97 : vector<8x8xf32> to vector<8x8xbf16>
    %cst_31 = arith.constant dense<0.000000e+00> : vector<8x8xf32>
    %99 = tpu.matmul %98, %86, %cst_31 {dimension_numbers = #tpu.dot_dimension_numbers<[1], [0], [0], [1], [0, 0, 1, 1], [], []>} : vector<8x8xbf16>, vector<8x8xbf16>, vector<8x8xf32> -> vector<8x8xf32>
    %c8_32 = arith.constant 8 : index
    %c0_33 = arith.constant 0 : index
    %100 = vector.load %arg23[%c8_32, %c0_33] : memref<16x32xf32, #tpu.memory_space<vmem>>, vector<8x8xf32>
    tpu.vector_store %arg23[%c8_32, %c0_33], %99 {strides = array<i32>} : memref<16x32xf32, #tpu.memory_space<vmem>>, vector<8x8xf32>,
    %101 = vector.extract_strided_slice %81 {offsets = [0, 8], sizes = [8, 8], strides = [1, 1]} : vector<8x32xbf16> to vector<8x8xbf16>
    %102 = vector.extract_strided_slice %83 {offsets = [0, 40], sizes = [8, 8], strides = [1, 1]} : vector<8x96xbf16> to vector<8x8xbf16>
    %103 = vector.extract_strided_slice %83 {offsets = [0, 72], sizes = [8, 8], strides = [1, 1]} : vector<8x96xbf16> to vector<8x8xbf16>
    %cst_34 = arith.constant dense<0.000000e+00> : vector<8x8xf32>
    %104 = tpu.matmul %101, %102, %cst_34 {dimension_numbers = #tpu.dot_dimension_numbers<[1], [1], [0], [0], [0, 0, 1, 0], [], []>} : vector<8x8xbf16>, vector<8x8xbf16>, vector<8x8xf32> -> vector<8x8xf32>
    %cst_35 = arith.constant dense<0xFF800000> : vector<8xf32>
    %105 = vector.multi_reduction <maximumf>, %104, %cst_35 [1] : vector<8x8xf32> to vector<8xf32>
    %106 = vector.shape_cast %105 : vector<8xf32> to vector<8x1xf32>
    %107 = vector.broadcast %106 : vector<8x1xf32> to vector<8x8xf32>
    %108 = arith.subf %104, %107 : vector<8x8xf32>
    %109 = math.exp %108 : vector<8x8xf32>
    %cst_36 = arith.constant dense<0.000000e+00> : vector<8xf32>
    %110 = vector.multi_reduction <add>, %109, %cst_36 [1] : vector<8x8xf32> to vector<8xf32>
    %111 = vector.shape_cast %110 : vector<8xf32> to vector<8x1xf32>
    %112 = tpu.reciprocal %111 {approx = true} : vector<8x1xf32> -> vector<8x1xf32>
    %113 = vector.broadcast %112 : vector<8x1xf32> to vector<8x8xf32>
    %114 = arith.mulf %109, %113 : vector<8x8xf32>
    %115 = arith.truncf %114 : vector<8x8xf32> to vector<8x8xbf16>
    %cst_37 = arith.constant dense<0.000000e+00> : vector<8x8xf32>
    %116 = tpu.matmul %115, %103, %cst_37 {dimension_numbers = #tpu.dot_dimension_numbers<[1], [0], [0], [1], [0, 0, 1, 1], [], []>} : vector<8x8xbf16>, vector<8x8xbf16>, vector<8x8xf32> -> vector<8x8xf32>
    %c8_38 = arith.constant 8 : index
    %c8_39 = arith.constant 8 : index
    %117 = vector.load %arg23[%c8_38, %c8_39] : memref<16x32xf32, #tpu.memory_space<vmem>>, vector<8x8xf32>
    tpu.vector_store %arg23[%c8_38, %c8_39], %116 {strides = array<i32>} : memref<16x32xf32, #tpu.memory_space<vmem>>, vector<8x8xf32>,
    %118 = vector.extract_strided_slice %81 {offsets = [0, 16], sizes = [8, 8], strides = [1, 1]} : vector<8x32xbf16> to vector<8x8xbf16>
    %119 = vector.extract_strided_slice %83 {offsets = [0, 48], sizes = [8, 8], strides = [1, 1]} : vector<8x96xbf16> to vector<8x8xbf16>
    %120 = vector.extract_strided_slice %83 {offsets = [0, 80], sizes = [8, 8], strides = [1, 1]} : vector<8x96xbf16> to vector<8x8xbf16>
    %cst_40 = arith.constant dense<0.000000e+00> : vector<8x8xf32>
    %121 = tpu.matmul %118, %119, %cst_40 {dimension_numbers = #tpu.dot_dimension_numbers<[1], [1], [0], [0], [0, 0, 1, 0], [], []>} : vector<8x8xbf16>, vector<8x8xbf16>, vector<8x8xf32> -> vector<8x8xf32>
    %cst_41 = arith.constant dense<0xFF800000> : vector<8xf32>
    %122 = vector.multi_reduction <maximumf>, %121, %cst_41 [1] : vector<8x8xf32> to vector<8xf32>
    %123 = vector.shape_cast %122 : vector<8xf32> to vector<8x1xf32>
    %124 = vector.broadcast %123 : vector<8x1xf32> to vector<8x8xf32>
    %125 = arith.subf %121, %124 : vector<8x8xf32>
    %126 = math.exp %125 : vector<8x8xf32>
    %cst_42 = arith.constant dense<0.000000e+00> : vector<8xf32>
    %127 = vector.multi_reduction <add>, %126, %cst_42 [1] : vector<8x8xf32> to vector<8xf32>
    %128 = vector.shape_cast %127 : vector<8xf32> to vector<8x1xf32>
    %129 = tpu.reciprocal %128 {approx = true} : vector<8x1xf32> -> vector<8x1xf32>
    %130 = vector.broadcast %129 : vector<8x1xf32> to vector<8x8xf32>
    %131 = arith.mulf %126, %130 : vector<8x8xf32>
    %132 = arith.truncf %131 : vector<8x8xf32> to vector<8x8xbf16>
    %cst_43 = arith.constant dense<0.000000e+00> : vector<8x8xf32>
    %133 = tpu.matmul %132, %120, %cst_43 {dimension_numbers = #tpu.dot_dimension_numbers<[1], [0], [0], [1], [0, 0, 1, 1], [], []>} : vector<8x8xbf16>, vector<8x8xbf16>, vector<8x8xf32> -> vector<8x8xf32>
    %c8_44 = arith.constant 8 : index
    %c16_45 = arith.constant 16 : index
    %134 = vector.load %arg23[%c8_44, %c16_45] : memref<16x32xf32, #tpu.memory_space<vmem>>, vector<8x8xf32>
    tpu.vector_store %arg23[%c8_44, %c16_45], %133 {strides = array<i32>} : memref<16x32xf32, #tpu.memory_space<vmem>>, vector<8x8xf32>,
    %135 = vector.extract_strided_slice %81 {offsets = [0, 24], sizes = [8, 8], strides = [1, 1]} : vector<8x32xbf16> to vector<8x8xbf16>
    %136 = vector.extract_strided_slice %83 {offsets = [0, 56], sizes = [8, 8], strides = [1, 1]} : vector<8x96xbf16> to vector<8x8xbf16>
    %137 = vector.extract_strided_slice %83 {offsets = [0, 88], sizes = [8, 8], strides = [1, 1]} : vector<8x96xbf16> to vector<8x8xbf16>
    %cst_46 = arith.constant dense<0.000000e+00> : vector<8x8xf32>
    %138 = tpu.matmul %135, %136, %cst_46 {dimension_numbers = #tpu.dot_dimension_numbers<[1], [1], [0], [0], [0, 0, 1, 0], [], []>} : vector<8x8xbf16>, vector<8x8xbf16>, vector<8x8xf32> -> vector<8x8xf32>
    %cst_47 = arith.constant dense<0xFF800000> : vector<8xf32>
    %139 = vector.multi_reduction <maximumf>, %138, %cst_47 [1] : vector<8x8xf32> to vector<8xf32>
    %140 = vector.shape_cast %139 : vector<8xf32> to vector<8x1xf32>
    %141 = vector.broadcast %140 : vector<8x1xf32> to vector<8x8xf32>
    %142 = arith.subf %138, %141 : vector<8x8xf32>
    %143 = math.exp %142 : vector<8x8xf32>
    %cst_48 = arith.constant dense<0.000000e+00> : vector<8xf32>
    %144 = vector.multi_reduction <add>, %143, %cst_48 [1] : vector<8x8xf32> to vector<8xf32>
    %145 = vector.shape_cast %144 : vector<8xf32> to vector<8x1xf32>
    %146 = tpu.reciprocal %145 {approx = true} : vector<8x1xf32> -> vector<8x1xf32>
    %147 = vector.broadcast %146 : vector<8x1xf32> to vector<8x8xf32>
    %148 = arith.mulf %143, %147 : vector<8x8xf32>
    %149 = arith.truncf %148 : vector<8x8xf32> to vector<8x8xbf16>
    %cst_49 = arith.constant dense<0.000000e+00> : vector<8x8xf32>
    %150 = tpu.matmul %149, %137, %cst_49 {dimension_numbers = #tpu.dot_dimension_numbers<[1], [0], [0], [1], [0, 0, 1, 1], [], []>} : vector<8x8xbf16>, vector<8x8xbf16>, vector<8x8xf32> -> vector<8x8xf32>
    %c8_50 = arith.constant 8 : index
    %c24_51 = arith.constant 24 : index
    %151 = vector.load %arg23[%c8_50, %c24_51] : memref<16x32xf32, #tpu.memory_space<vmem>>, vector<8x8xf32>
    tpu.vector_store %arg23[%c8_50, %c24_51], %150 {strides = array<i32>} : memref<16x32xf32, #tpu.memory_space<vmem>>, vector<8x8xf32>,
    %c0_52 = arith.constant 0 : index
    %c0_53 = arith.constant 0 : index
    %152 = vector.load %arg23[%c0_52, %c0_53] : memref<16x32xf32, #tpu.memory_space<vmem>>, vector<16x32xf32>
    %153 = arith.truncf %152 : vector<16x32xf32> to vector<16x32xbf16>
    %c0_54 = arith.constant 0 : index
    %c0_55 = arith.constant 0 : index
    %154 = vector.load %arg4[%c0_54, %c0_55] : memref<32x32xbf16, #tpu.memory_space<vmem>>, vector<32x32xbf16>
    %cst_56 = arith.constant dense<0.000000e+00> : vector<16x32xf32>
    %155 = tpu.matmul %153, %154, %cst_56 {dimension_numbers = #tpu.dot_dimension_numbers<[1], [0], [0], [1], [0, 0, 1, 1], [], []>} : vector<16x32xbf16>, vector<32x32xbf16>, vector<16x32xf32> -> vector<16x32xf32>
    %c0_57 = arith.constant 0 : index
    %c0_58 = arith.constant 0 : index
    %156 = vector.load %arg5[%c0_57, %c0_58] : memref<1x32xf32, #tpu.memory_space<vmem>>, vector<1x32xf32>
    %157 = vector.broadcast %156 : vector<1x32xf32> to vector<16x32xf32>
    %158 = arith.addf %155, %157 : vector<16x32xf32>
    %159 = arith.addf %0, %158 : vector<16x32xf32>
    %cst_59 = arith.constant dense<0.000000e+00> : vector<16xf32>
    %160 = vector.multi_reduction <add>, %159, %cst_59 [1] : vector<16x32xf32> to vector<16xf32>
    %161 = vector.shape_cast %160 : vector<16xf32> to vector<16x1xf32>
    %cst_60 = arith.constant 3.200000e+01 : f32
    %162 = vector.broadcast %cst_60 : f32 to vector<16x1xf32>
    %163 = arith.divf %161, %162 : vector<16x1xf32>
    %164 = vector.broadcast %163 : vector<16x1xf32> to vector<16x32xf32>
    %165 = arith.subf %159, %164 : vector<16x32xf32>
    %166 = arith.mulf %165, %165 : vector<16x32xf32>
    %cst_61 = arith.constant dense<0.000000e+00> : vector<16xf32>
    %167 = vector.multi_reduction <add>, %166, %cst_61 [1] : vector<16x32xf32> to vector<16xf32>
    %168 = vector.shape_cast %167 : vector<16xf32> to vector<16x1xf32>
    %cst_62 = arith.constant 3.200000e+01 : f32
    %169 = vector.broadcast %cst_62 : f32 to vector<16x1xf32>
    %170 = arith.divf %168, %169 : vector<16x1xf32>
    %cst_63 = arith.constant 9.99999974E-6 : f32
    %171 = vector.broadcast %cst_63 : f32 to vector<16x1xf32>
    %172 = arith.addf %170, %171 : vector<16x1xf32>
    %173 = math.rsqrt %172 : vector<16x1xf32>
    %174 = vector.broadcast %173 : vector<16x1xf32> to vector<16x32xf32>
    %175 = arith.mulf %165, %174 : vector<16x32xf32>
    %c0_64 = arith.constant 0 : index
    %c0_65 = arith.constant 0 : index
    %176 = vector.load %arg16[%c0_64, %c0_65] : memref<1x32xf32, #tpu.memory_space<vmem>>, vector<1x32xf32>
    %177 = vector.broadcast %176 : vector<1x32xf32> to vector<16x32xf32>
    %178 = arith.mulf %175, %177 : vector<16x32xf32>
    %c0_66 = arith.constant 0 : index
    %c0_67 = arith.constant 0 : index
    %179 = vector.load %arg17[%c0_66, %c0_67] : memref<1x32xf32, #tpu.memory_space<vmem>>, vector<1x32xf32>
    %180 = vector.broadcast %179 : vector<1x32xf32> to vector<16x32xf32>
    %181 = arith.addf %178, %180 : vector<16x32xf32>
    %182 = arith.truncf %181 : vector<16x32xf32> to vector<16x32xbf16>
    %c0_68 = arith.constant 0 : index
    %c0_69 = arith.constant 0 : index
    %183 = vector.load %arg6[%c0_68, %c0_69] : memref<32x32xbf16, #tpu.memory_space<vmem>>, vector<32x32xbf16>
    %cst_70 = arith.constant dense<0.000000e+00> : vector<16x32xf32>
    %184 = tpu.matmul %182, %183, %cst_70 {dimension_numbers = #tpu.dot_dimension_numbers<[1], [0], [0], [1], [0, 0, 1, 1], [], []>} : vector<16x32xbf16>, vector<32x32xbf16>, vector<16x32xf32> -> vector<16x32xf32>
    %c0_71 = arith.constant 0 : index
    %c0_72 = arith.constant 0 : index
    %185 = vector.load %arg7[%c0_71, %c0_72] : memref<1x32xf32, #tpu.memory_space<vmem>>, vector<1x32xf32>
    %186 = vector.broadcast %185 : vector<1x32xf32> to vector<16x32xf32>
    %187 = arith.addf %184, %186 : vector<16x32xf32>
    %188 = arith.truncf %1 : vector<20x32xf32> to vector<20x32xbf16>
    %c0_73 = arith.constant 0 : index
    %c0_74 = arith.constant 0 : index
    %189 = vector.load %arg8[%c0_73, %c0_74] : memref<32x64xbf16, #tpu.memory_space<vmem>>, vector<32x64xbf16>
    %cst_75 = arith.constant dense<0.000000e+00> : vector<20x64xf32>
    %190 = tpu.matmul %188, %189, %cst_75 {dimension_numbers = #tpu.dot_dimension_numbers<[1], [0], [0], [1], [0, 0, 1, 1], [], []>} : vector<20x32xbf16>, vector<32x64xbf16>, vector<20x64xf32> -> vector<20x64xf32>
    %c0_76 = arith.constant 0 : index
    %c0_77 = arith.constant 0 : index
    %191 = vector.load %arg9[%c0_76, %c0_77] : memref<1x64xf32, #tpu.memory_space<vmem>>, vector<1x64xf32>
    %192 = vector.broadcast %191 : vector<1x64xf32> to vector<20x64xf32>
    %193 = arith.addf %190, %192 : vector<20x64xf32>
    %194 = vector.extract_strided_slice %187 {offsets = [0, 0], sizes = [8, 32], strides = [1, 1]} : vector<16x32xf32> to vector<8x32xf32>
    %195 = arith.truncf %194 : vector<8x32xf32> to vector<8x32xbf16>
    %196 = vector.extract_strided_slice %193 {offsets = [0, 0], sizes = [10, 64], strides = [1, 1]} : vector<20x64xf32> to vector<10x64xf32>
    %197 = arith.truncf %196 : vector<10x64xf32> to vector<10x64xbf16>
    %198 = vector.extract_strided_slice %195 {offsets = [0, 0], sizes = [8, 8], strides = [1, 1]} : vector<8x32xbf16> to vector<8x8xbf16>
    %199 = vector.extract_strided_slice %197 {offsets = [0, 0], sizes = [10, 8], strides = [1, 1]} : vector<10x64xbf16> to vector<10x8xbf16>
    %200 = vector.extract_strided_slice %197 {offsets = [0, 32], sizes = [10, 8], strides = [1, 1]} : vector<10x64xbf16> to vector<10x8xbf16>
    %cst_78 = arith.constant dense<0.000000e+00> : vector<8x10xf32>
    %201 = tpu.matmul %198, %199, %cst_78 {dimension_numbers = #tpu.dot_dimension_numbers<[1], [1], [0], [0], [0, 0, 1, 0], [], []>} : vector<8x8xbf16>, vector<10x8xbf16>, vector<8x10xf32> -> vector<8x10xf32>
    %cst_79 = arith.constant dense<0xFF800000> : vector<8xf32>
    %202 = vector.multi_reduction <maximumf>, %201, %cst_79 [1] : vector<8x10xf32> to vector<8xf32>
    %203 = vector.shape_cast %202 : vector<8xf32> to vector<8x1xf32>
    %204 = vector.broadcast %203 : vector<8x1xf32> to vector<8x10xf32>
    %205 = arith.subf %201, %204 : vector<8x10xf32>
    %206 = math.exp %205 : vector<8x10xf32>
    %cst_80 = arith.constant dense<0.000000e+00> : vector<8xf32>
    %207 = vector.multi_reduction <add>, %206, %cst_80 [1] : vector<8x10xf32> to vector<8xf32>
    %208 = vector.shape_cast %207 : vector<8xf32> to vector<8x1xf32>
    %209 = tpu.reciprocal %208 {approx = true} : vector<8x1xf32> -> vector<8x1xf32>
    %210 = vector.broadcast %209 : vector<8x1xf32> to vector<8x10xf32>
    %211 = arith.mulf %206, %210 : vector<8x10xf32>
    %212 = arith.truncf %211 : vector<8x10xf32> to vector<8x10xbf16>
    %cst_81 = arith.constant dense<0.000000e+00> : vector<8x8xf32>
    %213 = tpu.matmul %212, %200, %cst_81 {dimension_numbers = #tpu.dot_dimension_numbers<[1], [0], [0], [1], [0, 0, 1, 1], [], []>} : vector<8x10xbf16>, vector<10x8xbf16>, vector<8x8xf32> -> vector<8x8xf32>
    %c0_82 = arith.constant 0 : index
    %c0_83 = arith.constant 0 : index
    %214 = vector.load %arg23[%c0_82, %c0_83] : memref<16x32xf32, #tpu.memory_space<vmem>>, vector<8x8xf32>
    tpu.vector_store %arg23[%c0_82, %c0_83], %213 {strides = array<i32>} : memref<16x32xf32, #tpu.memory_space<vmem>>, vector<8x8xf32>,
    %215 = vector.extract_strided_slice %195 {offsets = [0, 8], sizes = [8, 8], strides = [1, 1]} : vector<8x32xbf16> to vector<8x8xbf16>
    %216 = vector.extract_strided_slice %197 {offsets = [0, 8], sizes = [10, 8], strides = [1, 1]} : vector<10x64xbf16> to vector<10x8xbf16>
    %217 = vector.extract_strided_slice %197 {offsets = [0, 40], sizes = [10, 8], strides = [1, 1]} : vector<10x64xbf16> to vector<10x8xbf16>
    %cst_84 = arith.constant dense<0.000000e+00> : vector<8x10xf32>
    %218 = tpu.matmul %215, %216, %cst_84 {dimension_numbers = #tpu.dot_dimension_numbers<[1], [1], [0], [0], [0, 0, 1, 0], [], []>} : vector<8x8xbf16>, vector<10x8xbf16>, vector<8x10xf32> -> vector<8x10xf32>
    %cst_85 = arith.constant dense<0xFF800000> : vector<8xf32>
    %219 = vector.multi_reduction <maximumf>, %218, %cst_85 [1] : vector<8x10xf32> to vector<8xf32>
    %220 = vector.shape_cast %219 : vector<8xf32> to vector<8x1xf32>
    %221 = vector.broadcast %220 : vector<8x1xf32> to vector<8x10xf32>
    %222 = arith.subf %218, %221 : vector<8x10xf32>
    %223 = math.exp %222 : vector<8x10xf32>
    %cst_86 = arith.constant dense<0.000000e+00> : vector<8xf32>
    %224 = vector.multi_reduction <add>, %223, %cst_86 [1] : vector<8x10xf32> to vector<8xf32>
    %225 = vector.shape_cast %224 : vector<8xf32> to vector<8x1xf32>
    %226 = tpu.reciprocal %225 {approx = true} : vector<8x1xf32> -> vector<8x1xf32>
    %227 = vector.broadcast %226 : vector<8x1xf32> to vector<8x10xf32>
    %228 = arith.mulf %223, %227 : vector<8x10xf32>
    %229 = arith.truncf %228 : vector<8x10xf32> to vector<8x10xbf16>
    %cst_87 = arith.constant dense<0.000000e+00> : vector<8x8xf32>
    %230 = tpu.matmul %229, %217, %cst_87 {dimension_numbers = #tpu.dot_dimension_numbers<[1], [0], [0], [1], [0, 0, 1, 1], [], []>} : vector<8x10xbf16>, vector<10x8xbf16>, vector<8x8xf32> -> vector<8x8xf32>
    %c0_88 = arith.constant 0 : index
    %c8_89 = arith.constant 8 : index
    %231 = vector.load %arg23[%c0_88, %c8_89] : memref<16x32xf32, #tpu.memory_space<vmem>>, vector<8x8xf32>
    tpu.vector_store %arg23[%c0_88, %c8_89], %230 {strides = array<i32>} : memref<16x32xf32, #tpu.memory_space<vmem>>, vector<8x8xf32>,
    %232 = vector.extract_strided_slice %195 {offsets = [0, 16], sizes = [8, 8], strides = [1, 1]} : vector<8x32xbf16> to vector<8x8xbf16>
    %233 = vector.extract_strided_slice %197 {offsets = [0, 16], sizes = [10, 8], strides = [1, 1]} : vector<10x64xbf16> to vector<10x8xbf16>
    %234 = vector.extract_strided_slice %197 {offsets = [0, 48], sizes = [10, 8], strides = [1, 1]} : vector<10x64xbf16> to vector<10x8xbf16>
    %cst_90 = arith.constant dense<0.000000e+00> : vector<8x10xf32>
    %235 = tpu.matmul %232, %233, %cst_90 {dimension_numbers = #tpu.dot_dimension_numbers<[1], [1], [0], [0], [0, 0, 1, 0], [], []>} : vector<8x8xbf16>, vector<10x8xbf16>, vector<8x10xf32> -> vector<8x10xf32>
    %cst_91 = arith.constant dense<0xFF800000> : vector<8xf32>
    %236 = vector.multi_reduction <maximumf>, %235, %cst_91 [1] : vector<8x10xf32> to vector<8xf32>
    %237 = vector.shape_cast %236 : vector<8xf32> to vector<8x1xf32>
    %238 = vector.broadcast %237 : vector<8x1xf32> to vector<8x10xf32>
    %239 = arith.subf %235, %238 : vector<8x10xf32>
    %240 = math.exp %239 : vector<8x10xf32>
    %cst_92 = arith.constant dense<0.000000e+00> : vector<8xf32>
    %241 = vector.multi_reduction <add>, %240, %cst_92 [1] : vector<8x10xf32> to vector<8xf32>
    %242 = vector.shape_cast %241 : vector<8xf32> to vector<8x1xf32>
    %243 = tpu.reciprocal %242 {approx = true} : vector<8x1xf32> -> vector<8x1xf32>
    %244 = vector.broadcast %243 : vector<8x1xf32> to vector<8x10xf32>
    %245 = arith.mulf %240, %244 : vector<8x10xf32>
    %246 = arith.truncf %245 : vector<8x10xf32> to vector<8x10xbf16>
    %cst_93 = arith.constant dense<0.000000e+00> : vector<8x8xf32>
    %247 = tpu.matmul %246, %234, %cst_93 {dimension_numbers = #tpu.dot_dimension_numbers<[1], [0], [0], [1], [0, 0, 1, 1], [], []>} : vector<8x10xbf16>, vector<10x8xbf16>, vector<8x8xf32> -> vector<8x8xf32>
    %c0_94 = arith.constant 0 : index
    %c16_95 = arith.constant 16 : index
    %248 = vector.load %arg23[%c0_94, %c16_95] : memref<16x32xf32, #tpu.memory_space<vmem>>, vector<8x8xf32>
    tpu.vector_store %arg23[%c0_94, %c16_95], %247 {strides = array<i32>} : memref<16x32xf32, #tpu.memory_space<vmem>>, vector<8x8xf32>,
    %249 = vector.extract_strided_slice %195 {offsets = [0, 24], sizes = [8, 8], strides = [1, 1]} : vector<8x32xbf16> to vector<8x8xbf16>
    %250 = vector.extract_strided_slice %197 {offsets = [0, 24], sizes = [10, 8], strides = [1, 1]} : vector<10x64xbf16> to vector<10x8xbf16>
    %251 = vector.extract_strided_slice %197 {offsets = [0, 56], sizes = [10, 8], strides = [1, 1]} : vector<10x64xbf16> to vector<10x8xbf16>
    %cst_96 = arith.constant dense<0.000000e+00> : vector<8x10xf32>
    %252 = tpu.matmul %249, %250, %cst_96 {dimension_numbers = #tpu.dot_dimension_numbers<[1], [1], [0], [0], [0, 0, 1, 0], [], []>} : vector<8x8xbf16>, vector<10x8xbf16>, vector<8x10xf32> -> vector<8x10xf32>
    %cst_97 = arith.constant dense<0xFF800000> : vector<8xf32>
    %253 = vector.multi_reduction <maximumf>, %252, %cst_97 [1] : vector<8x10xf32> to vector<8xf32>
    %254 = vector.shape_cast %253 : vector<8xf32> to vector<8x1xf32>
    %255 = vector.broadcast %254 : vector<8x1xf32> to vector<8x10xf32>
    %256 = arith.subf %252, %255 : vector<8x10xf32>
    %257 = math.exp %256 : vector<8x10xf32>
    %cst_98 = arith.constant dense<0.000000e+00> : vector<8xf32>
    %258 = vector.multi_reduction <add>, %257, %cst_98 [1] : vector<8x10xf32> to vector<8xf32>
    %259 = vector.shape_cast %258 : vector<8xf32> to vector<8x1xf32>
    %260 = tpu.reciprocal %259 {approx = true} : vector<8x1xf32> -> vector<8x1xf32>
    %261 = vector.broadcast %260 : vector<8x1xf32> to vector<8x10xf32>
    %262 = arith.mulf %257, %261 : vector<8x10xf32>
    %263 = arith.truncf %262 : vector<8x10xf32> to vector<8x10xbf16>
    %cst_99 = arith.constant dense<0.000000e+00> : vector<8x8xf32>
    %264 = tpu.matmul %263, %251, %cst_99 {dimension_numbers = #tpu.dot_dimension_numbers<[1], [0], [0], [1], [0, 0, 1, 1], [], []>} : vector<8x10xbf16>, vector<10x8xbf16>, vector<8x8xf32> -> vector<8x8xf32>
    %c0_100 = arith.constant 0 : index
    %c24_101 = arith.constant 24 : index
    %265 = vector.load %arg23[%c0_100, %c24_101] : memref<16x32xf32, #tpu.memory_space<vmem>>, vector<8x8xf32>
    tpu.vector_store %arg23[%c0_100, %c24_101], %264 {strides = array<i32>} : memref<16x32xf32, #tpu.memory_space<vmem>>, vector<8x8xf32>,
    %266 = vector.extract_strided_slice %187 {offsets = [8, 0], sizes = [8, 32], strides = [1, 1]} : vector<16x32xf32> to vector<8x32xf32>
    %267 = arith.truncf %266 : vector<8x32xf32> to vector<8x32xbf16>
    %268 = vector.extract_strided_slice %193 {offsets = [10, 0], sizes = [10, 64], strides = [1, 1]} : vector<20x64xf32> to vector<10x64xf32>
    %269 = arith.truncf %268 : vector<10x64xf32> to vector<10x64xbf16>
    %270 = vector.extract_strided_slice %267 {offsets = [0, 0], sizes = [8, 8], strides = [1, 1]} : vector<8x32xbf16> to vector<8x8xbf16>
    %271 = vector.extract_strided_slice %269 {offsets = [0, 0], sizes = [10, 8], strides = [1, 1]} : vector<10x64xbf16> to vector<10x8xbf16>
    %272 = vector.extract_strided_slice %269 {offsets = [0, 32], sizes = [10, 8], strides = [1, 1]} : vector<10x64xbf16> to vector<10x8xbf16>
    %cst_102 = arith.constant dense<0.000000e+00> : vector<8x10xf32>
    %273 = tpu.matmul %270, %271, %cst_102 {dimension_numbers = #tpu.dot_dimension_numbers<[1], [1], [0], [0], [0, 0, 1, 0], [], []>} : vector<8x8xbf16>, vector<10x8xbf16>, vector<8x10xf32> -> vector<8x10xf32>
    %cst_103 = arith.constant dense<0xFF800000> : vector<8xf32>
    %274 = vector.multi_reduction <maximumf>, %273, %cst_103 [1] : vector<8x10xf32> to vector<8xf32>
    %275 = vector.shape_cast %274 : vector<8xf32> to vector<8x1xf32>
    %276 = vector.broadcast %275 : vector<8x1xf32> to vector<8x10xf32>
    %277 = arith.subf %273, %276 : vector<8x10xf32>
    %278 = math.exp %277 : vector<8x10xf32>
    %cst_104 = arith.constant dense<0.000000e+00> : vector<8xf32>
    %279 = vector.multi_reduction <add>, %278, %cst_104 [1] : vector<8x10xf32> to vector<8xf32>
    %280 = vector.shape_cast %279 : vector<8xf32> to vector<8x1xf32>
    %281 = tpu.reciprocal %280 {approx = true} : vector<8x1xf32> -> vector<8x1xf32>
    %282 = vector.broadcast %281 : vector<8x1xf32> to vector<8x10xf32>
    %283 = arith.mulf %278, %282 : vector<8x10xf32>
    %284 = arith.truncf %283 : vector<8x10xf32> to vector<8x10xbf16>
    %cst_105 = arith.constant dense<0.000000e+00> : vector<8x8xf32>
    %285 = tpu.matmul %284, %272, %cst_105 {dimension_numbers = #tpu.dot_dimension_numbers<[1], [0], [0], [1], [0, 0, 1, 1], [], []>} : vector<8x10xbf16>, vector<10x8xbf16>, vector<8x8xf32> -> vector<8x8xf32>
    %c8_106 = arith.constant 8 : index
    %c0_107 = arith.constant 0 : index
    %286 = vector.load %arg23[%c8_106, %c0_107] : memref<16x32xf32, #tpu.memory_space<vmem>>, vector<8x8xf32>
    tpu.vector_store %arg23[%c8_106, %c0_107], %285 {strides = array<i32>} : memref<16x32xf32, #tpu.memory_space<vmem>>, vector<8x8xf32>,
    %287 = vector.extract_strided_slice %267 {offsets = [0, 8], sizes = [8, 8], strides = [1, 1]} : vector<8x32xbf16> to vector<8x8xbf16>
    %288 = vector.extract_strided_slice %269 {offsets = [0, 8], sizes = [10, 8], strides = [1, 1]} : vector<10x64xbf16> to vector<10x8xbf16>
    %289 = vector.extract_strided_slice %269 {offsets = [0, 40], sizes = [10, 8], strides = [1, 1]} : vector<10x64xbf16> to vector<10x8xbf16>
    %cst_108 = arith.constant dense<0.000000e+00> : vector<8x10xf32>
    %290 = tpu.matmul %287, %288, %cst_108 {dimension_numbers = #tpu.dot_dimension_numbers<[1], [1], [0], [0], [0, 0, 1, 0], [], []>} : vector<8x8xbf16>, vector<10x8xbf16>, vector<8x10xf32> -> vector<8x10xf32>
    %cst_109 = arith.constant dense<0xFF800000> : vector<8xf32>
    %291 = vector.multi_reduction <maximumf>, %290, %cst_109 [1] : vector<8x10xf32> to vector<8xf32>
    %292 = vector.shape_cast %291 : vector<8xf32> to vector<8x1xf32>
    %293 = vector.broadcast %292 : vector<8x1xf32> to vector<8x10xf32>
    %294 = arith.subf %290, %293 : vector<8x10xf32>
    %295 = math.exp %294 : vector<8x10xf32>
    %cst_110 = arith.constant dense<0.000000e+00> : vector<8xf32>
    %296 = vector.multi_reduction <add>, %295, %cst_110 [1] : vector<8x10xf32> to vector<8xf32>
    %297 = vector.shape_cast %296 : vector<8xf32> to vector<8x1xf32>
    %298 = tpu.reciprocal %297 {approx = true} : vector<8x1xf32> -> vector<8x1xf32>
    %299 = vector.broadcast %298 : vector<8x1xf32> to vector<8x10xf32>
    %300 = arith.mulf %295, %299 : vector<8x10xf32>
    %301 = arith.truncf %300 : vector<8x10xf32> to vector<8x10xbf16>
    %cst_111 = arith.constant dense<0.000000e+00> : vector<8x8xf32>
    %302 = tpu.matmul %301, %289, %cst_111 {dimension_numbers = #tpu.dot_dimension_numbers<[1], [0], [0], [1], [0, 0, 1, 1], [], []>} : vector<8x10xbf16>, vector<10x8xbf16>, vector<8x8xf32> -> vector<8x8xf32>
    %c8_112 = arith.constant 8 : index
    %c8_113 = arith.constant 8 : index
    %303 = vector.load %arg23[%c8_112, %c8_113] : memref<16x32xf32, #tpu.memory_space<vmem>>, vector<8x8xf32>
    tpu.vector_store %arg23[%c8_112, %c8_113], %302 {strides = array<i32>} : memref<16x32xf32, #tpu.memory_space<vmem>>, vector<8x8xf32>,
    %304 = vector.extract_strided_slice %267 {offsets = [0, 16], sizes = [8, 8], strides = [1, 1]} : vector<8x32xbf16> to vector<8x8xbf16>
    %305 = vector.extract_strided_slice %269 {offsets = [0, 16], sizes = [10, 8], strides = [1, 1]} : vector<10x64xbf16> to vector<10x8xbf16>
    %306 = vector.extract_strided_slice %269 {offsets = [0, 48], sizes = [10, 8], strides = [1, 1]} : vector<10x64xbf16> to vector<10x8xbf16>
    %cst_114 = arith.constant dense<0.000000e+00> : vector<8x10xf32>
    %307 = tpu.matmul %304, %305, %cst_114 {dimension_numbers = #tpu.dot_dimension_numbers<[1], [1], [0], [0], [0, 0, 1, 0], [], []>} : vector<8x8xbf16>, vector<10x8xbf16>, vector<8x10xf32> -> vector<8x10xf32>
    %cst_115 = arith.constant dense<0xFF800000> : vector<8xf32>
    %308 = vector.multi_reduction <maximumf>, %307, %cst_115 [1] : vector<8x10xf32> to vector<8xf32>
    %309 = vector.shape_cast %308 : vector<8xf32> to vector<8x1xf32>
    %310 = vector.broadcast %309 : vector<8x1xf32> to vector<8x10xf32>
    %311 = arith.subf %307, %310 : vector<8x10xf32>
    %312 = math.exp %311 : vector<8x10xf32>
    %cst_116 = arith.constant dense<0.000000e+00> : vector<8xf32>
    %313 = vector.multi_reduction <add>, %312, %cst_116 [1] : vector<8x10xf32> to vector<8xf32>
    %314 = vector.shape_cast %313 : vector<8xf32> to vector<8x1xf32>
    %315 = tpu.reciprocal %314 {approx = true} : vector<8x1xf32> -> vector<8x1xf32>
    %316 = vector.broadcast %315 : vector<8x1xf32> to vector<8x10xf32>
    %317 = arith.mulf %312, %316 : vector<8x10xf32>
    %318 = arith.truncf %317 : vector<8x10xf32> to vector<8x10xbf16>
    %cst_117 = arith.constant dense<0.000000e+00> : vector<8x8xf32>
    %319 = tpu.matmul %318, %306, %cst_117 {dimension_numbers = #tpu.dot_dimension_numbers<[1], [0], [0], [1], [0, 0, 1, 1], [], []>} : vector<8x10xbf16>, vector<10x8xbf16>, vector<8x8xf32> -> vector<8x8xf32>
    %c8_118 = arith.constant 8 : index
    %c16_119 = arith.constant 16 : index
    %320 = vector.load %arg23[%c8_118, %c16_119] : memref<16x32xf32, #tpu.memory_space<vmem>>, vector<8x8xf32>
    tpu.vector_store %arg23[%c8_118, %c16_119], %319 {strides = array<i32>} : memref<16x32xf32, #tpu.memory_space<vmem>>, vector<8x8xf32>,
    %321 = vector.extract_strided_slice %267 {offsets = [0, 24], sizes = [8, 8], strides = [1, 1]} : vector<8x32xbf16> to vector<8x8xbf16>
    %322 = vector.extract_strided_slice %269 {offsets = [0, 24], sizes = [10, 8], strides = [1, 1]} : vector<10x64xbf16> to vector<10x8xbf16>
    %323 = vector.extract_strided_slice %269 {offsets = [0, 56], sizes = [10, 8], strides = [1, 1]} : vector<10x64xbf16> to vector<10x8xbf16>
    %cst_120 = arith.constant dense<0.000000e+00> : vector<8x10xf32>
    %324 = tpu.matmul %321, %322, %cst_120 {dimension_numbers = #tpu.dot_dimension_numbers<[1], [1], [0], [0], [0, 0, 1, 0], [], []>} : vector<8x8xbf16>, vector<10x8xbf16>, vector<8x10xf32> -> vector<8x10xf32>
    %cst_121 = arith.constant dense<0xFF800000> : vector<8xf32>
    %325 = vector.multi_reduction <maximumf>, %324, %cst_121 [1] : vector<8x10xf32> to vector<8xf32>
    %326 = vector.shape_cast %325 : vector<8xf32> to vector<8x1xf32>
    %327 = vector.broadcast %326 : vector<8x1xf32> to vector<8x10xf32>
    %328 = arith.subf %324, %327 : vector<8x10xf32>
    %329 = math.exp %328 : vector<8x10xf32>
    %cst_122 = arith.constant dense<0.000000e+00> : vector<8xf32>
    %330 = vector.multi_reduction <add>, %329, %cst_122 [1] : vector<8x10xf32> to vector<8xf32>
    %331 = vector.shape_cast %330 : vector<8xf32> to vector<8x1xf32>
    %332 = tpu.reciprocal %331 {approx = true} : vector<8x1xf32> -> vector<8x1xf32>
    %333 = vector.broadcast %332 : vector<8x1xf32> to vector<8x10xf32>
    %334 = arith.mulf %329, %333 : vector<8x10xf32>
    %335 = arith.truncf %334 : vector<8x10xf32> to vector<8x10xbf16>
    %cst_123 = arith.constant dense<0.000000e+00> : vector<8x8xf32>
    %336 = tpu.matmul %335, %323, %cst_123 {dimension_numbers = #tpu.dot_dimension_numbers<[1], [0], [0], [1], [0, 0, 1, 1], [], []>} : vector<8x10xbf16>, vector<10x8xbf16>, vector<8x8xf32> -> vector<8x8xf32>
    %c8_124 = arith.constant 8 : index
    %c24_125 = arith.constant 24 : index
    %337 = vector.load %arg23[%c8_124, %c24_125] : memref<16x32xf32, #tpu.memory_space<vmem>>, vector<8x8xf32>
    tpu.vector_store %arg23[%c8_124, %c24_125], %336 {strides = array<i32>} : memref<16x32xf32, #tpu.memory_space<vmem>>, vector<8x8xf32>,
    %c0_126 = arith.constant 0 : index
    %c0_127 = arith.constant 0 : index
    %338 = vector.load %arg23[%c0_126, %c0_127] : memref<16x32xf32, #tpu.memory_space<vmem>>, vector<16x32xf32>
    %339 = arith.truncf %338 : vector<16x32xf32> to vector<16x32xbf16>
    %c0_128 = arith.constant 0 : index
    %c0_129 = arith.constant 0 : index
    %340 = vector.load %arg10[%c0_128, %c0_129] : memref<32x32xbf16, #tpu.memory_space<vmem>>, vector<32x32xbf16>
    %cst_130 = arith.constant dense<0.000000e+00> : vector<16x32xf32>
    %341 = tpu.matmul %339, %340, %cst_130 {dimension_numbers = #tpu.dot_dimension_numbers<[1], [0], [0], [1], [0, 0, 1, 1], [], []>} : vector<16x32xbf16>, vector<32x32xbf16>, vector<16x32xf32> -> vector<16x32xf32>
    %c0_131 = arith.constant 0 : index
    %c0_132 = arith.constant 0 : index
    %342 = vector.load %arg11[%c0_131, %c0_132] : memref<1x32xf32, #tpu.memory_space<vmem>>, vector<1x32xf32>
    %343 = vector.broadcast %342 : vector<1x32xf32> to vector<16x32xf32>
    %344 = arith.addf %341, %343 : vector<16x32xf32>
    %345 = arith.addf %181, %344 : vector<16x32xf32>
    %cst_133 = arith.constant dense<0.000000e+00> : vector<16xf32>
    %346 = vector.multi_reduction <add>, %345, %cst_133 [1] : vector<16x32xf32> to vector<16xf32>
    %347 = vector.shape_cast %346 : vector<16xf32> to vector<16x1xf32>
    %cst_134 = arith.constant 3.200000e+01 : f32
    %348 = vector.broadcast %cst_134 : f32 to vector<16x1xf32>
    %349 = arith.divf %347, %348 : vector<16x1xf32>
    %350 = vector.broadcast %349 : vector<16x1xf32> to vector<16x32xf32>
    %351 = arith.subf %345, %350 : vector<16x32xf32>
    %352 = arith.mulf %351, %351 : vector<16x32xf32>
    %cst_135 = arith.constant dense<0.000000e+00> : vector<16xf32>
    %353 = vector.multi_reduction <add>, %352, %cst_135 [1] : vector<16x32xf32> to vector<16xf32>
    %354 = vector.shape_cast %353 : vector<16xf32> to vector<16x1xf32>
    %cst_136 = arith.constant 3.200000e+01 : f32
    %355 = vector.broadcast %cst_136 : f32 to vector<16x1xf32>
    %356 = arith.divf %354, %355 : vector<16x1xf32>
    %cst_137 = arith.constant 9.99999974E-6 : f32
    %357 = vector.broadcast %cst_137 : f32 to vector<16x1xf32>
    %358 = arith.addf %356, %357 : vector<16x1xf32>
    %359 = math.rsqrt %358 : vector<16x1xf32>
    %360 = vector.broadcast %359 : vector<16x1xf32> to vector<16x32xf32>
    %361 = arith.mulf %351, %360 : vector<16x32xf32>
    %c0_138 = arith.constant 0 : index
    %c0_139 = arith.constant 0 : index
    %362 = vector.load %arg18[%c0_138, %c0_139] : memref<1x32xf32, #tpu.memory_space<vmem>>, vector<1x32xf32>
    %363 = vector.broadcast %362 : vector<1x32xf32> to vector<16x32xf32>
    %364 = arith.mulf %361, %363 : vector<16x32xf32>
    %c0_140 = arith.constant 0 : index
    %c0_141 = arith.constant 0 : index
    %365 = vector.load %arg19[%c0_140, %c0_141] : memref<1x32xf32, #tpu.memory_space<vmem>>, vector<1x32xf32>
    %366 = vector.broadcast %365 : vector<1x32xf32> to vector<16x32xf32>
    %367 = arith.addf %364, %366 : vector<16x32xf32>
    %368 = arith.truncf %367 : vector<16x32xf32> to vector<16x32xbf16>
    %c0_142 = arith.constant 0 : index
    %c0_143 = arith.constant 0 : index
    %369 = vector.load %arg12[%c0_142, %c0_143] : memref<32x64xbf16, #tpu.memory_space<vmem>>, vector<32x64xbf16>
    %cst_144 = arith.constant dense<0.000000e+00> : vector<16x64xf32>
    %370 = tpu.matmul %368, %369, %cst_144 {dimension_numbers = #tpu.dot_dimension_numbers<[1], [0], [0], [1], [0, 0, 1, 1], [], []>} : vector<16x32xbf16>, vector<32x64xbf16>, vector<16x64xf32> -> vector<16x64xf32>
    %c0_145 = arith.constant 0 : index
    %c0_146 = arith.constant 0 : index
    %371 = vector.load %arg13[%c0_145, %c0_146] : memref<1x64xf32, #tpu.memory_space<vmem>>, vector<1x64xf32>
    %372 = vector.broadcast %371 : vector<1x64xf32> to vector<16x64xf32>
    %373 = arith.addf %370, %372 : vector<16x64xf32>
    %cst_147 = arith.constant 0.000000e+00 : f32
    %374 = vector.broadcast %cst_147 : f32 to vector<16x64xf32>
    %375 = arith.maximumf %373, %374 : vector<16x64xf32>
    %376 = arith.truncf %375 : vector<16x64xf32> to vector<16x64xbf16>
    %c0_148 = arith.constant 0 : index
    %c0_149 = arith.constant 0 : index
    %377 = vector.load %arg14[%c0_148, %c0_149] : memref<64x32xbf16, #tpu.memory_space<vmem>>, vector<64x32xbf16>
    %cst_150 = arith.constant dense<0.000000e+00> : vector<16x32xf32>
    %378 = tpu.matmul %376, %377, %cst_150 {dimension_numbers = #tpu.dot_dimension_numbers<[1], [0], [0], [1], [0, 0, 1, 1], [], []>} : vector<16x64xbf16>, vector<64x32xbf16>, vector<16x32xf32> -> vector<16x32xf32>
    %c0_151 = arith.constant 0 : index
    %c0_152 = arith.constant 0 : index
    %379 = vector.load %arg15[%c0_151, %c0_152] : memref<1x32xf32, #tpu.memory_space<vmem>>, vector<1x32xf32>
    %380 = vector.broadcast %379 : vector<1x32xf32> to vector<16x32xf32>
    %381 = arith.addf %378, %380 : vector<16x32xf32>
    %382 = arith.addf %367, %381 : vector<16x32xf32>
    %cst_153 = arith.constant dense<0.000000e+00> : vector<16xf32>
    %383 = vector.multi_reduction <add>, %382, %cst_153 [1] : vector<16x32xf32> to vector<16xf32>
    %384 = vector.shape_cast %383 : vector<16xf32> to vector<16x1xf32>
    %cst_154 = arith.constant 3.200000e+01 : f32
    %385 = vector.broadcast %cst_154 : f32 to vector<16x1xf32>
    %386 = arith.divf %384, %385 : vector<16x1xf32>
    %387 = vector.broadcast %386 : vector<16x1xf32> to vector<16x32xf32>
    %388 = arith.subf %382, %387 : vector<16x32xf32>
    %389 = arith.mulf %388, %388 : vector<16x32xf32>
    %cst_155 = arith.constant dense<0.000000e+00> : vector<16xf32>
    %390 = vector.multi_reduction <add>, %389, %cst_155 [1] : vector<16x32xf32> to vector<16xf32>
    %391 = vector.shape_cast %390 : vector<16xf32> to vector<16x1xf32>
    %cst_156 = arith.constant 3.200000e+01 : f32
    %392 = vector.broadcast %cst_156 : f32 to vector<16x1xf32>
    %393 = arith.divf %391, %392 : vector<16x1xf32>
    %cst_157 = arith.constant 9.99999974E-6 : f32
    %394 = vector.broadcast %cst_157 : f32 to vector<16x1xf32>
    %395 = arith.addf %393, %394 : vector<16x1xf32>
    %396 = math.rsqrt %395 : vector<16x1xf32>
    %397 = vector.broadcast %396 : vector<16x1xf32> to vector<16x32xf32>
    %398 = arith.mulf %388, %397 : vector<16x32xf32>
    %c0_158 = arith.constant 0 : index
    %c0_159 = arith.constant 0 : index
    %399 = vector.load %arg20[%c0_158, %c0_159] : memref<1x32xf32, #tpu.memory_space<vmem>>, vector<1x32xf32>
    %400 = vector.broadcast %399 : vector<1x32xf32> to vector<16x32xf32>
    %401 = arith.mulf %398, %400 : vector<16x32xf32>
    %c0_160 = arith.constant 0 : index
    %c0_161 = arith.constant 0 : index
    %402 = vector.load %arg21[%c0_160, %c0_161] : memref<1x32xf32, #tpu.memory_space<vmem>>, vector<1x32xf32>
    %403 = vector.broadcast %402 : vector<1x32xf32> to vector<16x32xf32>
    %404 = arith.addf %401, %403 : vector<16x32xf32>
    %c0_162 = arith.constant 0 : index
    %c0_163 = arith.constant 0 : index
    %405 = vector.load %arg22[%c0_162, %c0_163] : memref<16x32xf32, #tpu.memory_space<vmem>>, vector<16x32xf32>
    tpu.vector_store %arg22[%c0_162, %c0_163], %404 {strides = array<i32>} : memref<16x32xf32, #tpu.memory_space<vmem>>, vector<16x32xf32>,
    return
  }
}

</mosaic_0001>

<bundles_post_ra>
// kernel: transformer_decoder_layer.1
= control target key start
LH: loop header
LB: loop body
LE: loop exit
PB: predicated region body
PF: predicated region fallthrough
CT: control target
= control target key end

     0   :  { %v3082_v0 = vmov 0.0   ;;  %vm3083_vm0 = vmmov 0   ;;  %vm101_vm1 = vcmask 261120   ;;  %s3085_s27 = smov 96   ;;  %s3087_s28 = smov 88   ;;  %vm150_vm2 = vcmask 64512   ;;  %s3778_s2 = inlined_call_operand.vmem [shape: bf16[32,96], index: 2, kind: input, shape index: {}]   ;;  %s3779_s0 = inlined_call_operand.vmem [shape: f32[16,32], index: 0, kind: input, shape index: {}]   ;;  %s3780_s3 = inlined_call_operand.vmem [shape: f32[1,96], index: 3, kind: input, shape index: {}]   ;;  %s3781_s4 = inlined_call_operand.vmem [shape: bf16[32,32], index: 4, kind: input, shape index: {}]   ;;  %s3782_s5 = inlined_call_operand.vmem [shape: f32[1,32], index: 5, kind: input, shape index: {}]   ;;  %s3783_s8 = inlined_call_operand.vmem [shape: bf16[32,64], index: 8, kind: input, shape index: {}]   ;;  %s3784_s1 = inlined_call_operand.vmem [shape: f32[20,32], index: 1, kind: input, shape index: {}]   ;;  %s3785_s6 = inlined_call_operand.vmem [shape: bf16[32,32], index: 6, kind: input, shape index: {}]   ;;  %s3786_s16 = inlined_call_operand.vmem [shape: f32[1,32], index: 16, kind: input, shape index: {}]   ;;  %s3787_s17 = inlined_call_operand.vmem [shape: f32[1,32], index: 17, kind: input, shape index: {}]   ;;  %s3788_s9 = inlined_call_operand.vmem [shape: f32[1,64], index: 9, kind: input, shape index: {}]   ;;  %s3789_s7 = inlined_call_operand.vmem [shape: f32[1,32], index: 7, kind: input, shape index: {}]   ;;  %s3790_s10 = inlined_call_operand.vmem [shape: bf16[32,32], index: 10, kind: input, shape index: {}]   ;;  %s3791_s11 = inlined_call_operand.vmem [shape: f32[1,32], index: 11, kind: input, shape index: {}]   ;;  %s3792_s12 = inlined_call_operand.vmem [shape: bf16[32,64], index: 12, kind: input, shape index: {}]   ;;  %s3793_s14 = inlined_call_operand.vmem [shape: bf16[64,32], index: 14, kind: input, shape index: {}]   ;;  %s3794_s18 = inlined_call_operand.vmem [shape: f32[1,32], index: 18, kind: input, shape index: {}]   ;;  %s3795_s19 = inlined_call_operand.vmem [shape: f32[1,32], index: 19, kind: input, shape index: {}]   ;;  %s3796_s13 = inlined_call_operand.vmem [shape: f32[1,64], index: 13, kind: input, shape index: {}]   ;;  %s3797_s15 = inlined_call_operand.vmem [shape: f32[1,32], index: 15, kind: input, shape index: {}]   ;;  %s3798_s20 = inlined_call_operand.vmem [shape: f32[1,32], index: 20, kind: input, shape index: {}]   ;;  %s3799_s21 = inlined_call_operand.vmem [shape: f32[1,32], index: 21, kind: input, shape index: {}]   ;;  %s3800_s22 = inlined_call_operand.vmem [shape: f32[16,32], index: 22, kind: output, shape index: {}]  }
   0x1   :  { %3816 = sst [smem:[#allocation3_spill]] %s3778_s2  ;;  %2722 = vmatprep.subr.bf16.mxu1 %v3082_v0  ;;  %2726 = vmatprep.mubr.msk.bf16.mxu1 %vm3083_vm0, %v3082_v0  ;;  %s3089_s30 = smov 112   ;;  %vm214_vm3 = vcmask 1043456   ;;  %vm373_vm4 = vcmask 130112   ;;  %vm489_vm5 = vcmask 195712   ;;  %vm605_vm6 = vcmask 261312  }
   0x2   :  { %3817 = sst [smem:[#allocation4_spill]] %s3779_s0  ;;  %2736 = vmatprep.subr.bf16.mxu0 %v3082_v0  ;;  %2738 = vmatprep.mubr.msk.bf16.mxu0 %vm3083_vm0, %v3082_v0  ;;  %s3091_s2 = smov 56   ;;  %vm1375_vm7 = vcmask 80896   ;;  %vm1394_vm8 = vcmask 1044480   ;;  %vm2468_vm9 = vcmask 523264  }
   0x3   :  { %3818 = sst [smem:[#allocation5_spill]] %s3780_s3  ;;  %s3084_s3 = smov 120  }
   0x4   :  { %3819 = sst [smem:[#allocation6_spill]] %s3781_s4  ;;  %s3814_s4 = smov 80  }
   0x5   :  { %3820 = sst [smem:[#allocation7_spill]] %s3782_s5  ;;  %s3090_s5 = smov 104  }
   0x6   :  { %3821 = sst [smem:[#allocation8_spill]] %s3783_s8  ;;  %s3092_s23 = smov 64  }
   0x7   :  { %3822 = sst [smem:[#allocation9_spill]] %s3784_s1  ;;  %s3094_s8 = smov 40  }
   0x8   :  { %s3823_s29 = sld [smem:[#allocation3_spill]]  ;;  %s3810_s24 = smov 8  }
   0x9   :  { %s3824_s0 = sld [smem:[#allocation4_spill]]  ;;  %s3808_s1 = smov 16  }
   0xa   :  { %s3825_s26 = sld [smem:[#allocation5_spill]]  ;;  %s3806_s25 = smov 24  }
   0xe   :  { %v2990_v1 = vld [vmem:[%s3823_s29 + $0x8] sm:$0xff]   ;;  %v2991_v2 = vld [vmem:[%s3823_s29] sm:$0xff]   ;;  %s3812_s29 = smov 72  }
   0xf   :  { %2723 = vmatpush3.bf16.msra.mxu1 %v2990_v1  ;;  %v3228_v3 = vld [vmem:[%s3824_s0] sm:$0xff]  ;;  %v3233_v4 = vld [vmem:[%s3824_s0 + $0x8] sm:$0xff]  ;;  %s3093_s0 = smov 48  }
  0x10   :  { %2724 = vmatprep.subr.bf16.mxu1 %v3082_v0  ;;  %v77_v5 = vpack.c.bf16 %v3233_v4, %v3228_v3  ;;  %v2565_v6 = vld [vmem:[%s3825_s26] ss:$0 sm:$0xff]  ;;  %s3828_s26 = sld [smem:[#allocation8_spill]] }
  0x13   :  { %2725 = vmatpush3.bf16.msra.mxu1 %v2991_v2 }
  0x14   :  { %2730 = vmatprep.subr.bf16.mxu1 %v3082_v0 }
  0x16   :  { %2727 = vmatmul.mubr.msk.bf16.vlgmr.msra.gmra.mxu1 %vm101_vm1, %v77_v5 }
  0x17   :  { %2732 = vmatprep.mubr.msk.bf16.mxu1 %vm3083_vm0, %v3082_v0 }
  0xd6   :  { %v139_v7 = vpop.f32.mrf.mxu1 }
  0xd7   :  { %v140_v8 = vadd.f32 %v2565_v6, %v139_v7 }
  0xd8   :  { %v2728_v9 = vpop.f32.mrf.mxu1 }
  0xd9   :  { %v3245_v10 = vpack.c.bf16 %v140_v8, %v140_v8 }
  0xda   :  { %v142_v11 = vpop.f32.mrf.mxu1 }
  0xdb   :  { %259 = vrot.lane.b32.xlu1 %v3245_v10, %s3084_s3  ;;  %148 = vrot.lane.b32.xlu0 %v3245_v10, %s3085_s27  ;;  %v143_v13 = vadd.f32 %v2565_v6, %v142_v11 }
  0xdc   :  { %v2729_v12 = vpop.f32.mrf.mxu1 }
  0xdd   :  { %v3259_v14 = vpack.c.bf16 %v143_v13, %v143_v13 }
  0xdf   :  { %377 = vrot.lane.b32.xlu1 %v3245_v10, %s3814_s4  ;;  %261 = vrot.lane.b32.xlu0 %v3245_v10, %s3087_s28 }
  0xe3   :  { %493 = vrot.lane.b32.xlu1 %v3245_v10, %s3812_s29  ;;  %375 = vrot.lane.b32.xlu0 %v3245_v10, %s3089_s30 }
  0xe7   :  { %491 = vrot.lane.b32.xlu0 %v3245_v10, %s3090_s5  ;;  %609 = vrot.lane.b32.xlu1 %v3259_v14, %s3085_s27 }
  0xeb   :  { %720 = vrot.lane.b32.xlu0 %v3259_v14, %s3087_s28  ;;  %718 = vrot.lane.b32.xlu1 %v3259_v14, %s3084_s3 }
  0xef   :  { %835 = vrot.lane.b32.xlu0 %v3259_v14, %s3814_s4  ;;  %833 = vrot.lane.b32.xlu1 %v3259_v14, %s3089_s30 }
  0xf3   :  { %950 = vrot.lane.b32.xlu0 %v3259_v14, %s3812_s29  ;;  %948 = vrot.lane.b32.xlu1 %v3259_v14, %s3090_s5 }
 0x14d   :  { %v149_v15 = vpop.permute.xlu0 %148  ;;  %v260_v18 = vpop.permute.xlu1 %259 }
 0x14e   :  { %v155_v16 = vsel %vm150_vm2, %v149_v15, 0 }
 0x14f   :  { %2731 = vmatpush3.bf16.xpose.msra.mxu1 %v155_v16 }
 0x150   :  { %2742 = vmatprep.subr.bf16.mxu1 %v3082_v0 }
 0x151   :  { %v262_v17 = vpop.permute.xlu0 %261  ;;  %v378_v20 = vpop.permute.xlu1 %377 }
 0x152   :  { %v267_v19 = vsel %vm150_vm2, %v262_v17, 0  ;;  %v383_v21 = vsel %vm150_vm2, %v378_v20, 0 }
 0x155   :  { %v494_v22 = vpop.permute.xlu1 %493  ;;  %v376_v23 = vpop.permute.xlu0 %375 }
 0x156   :  { %2733 = vmatmul.mubr.msk.bf16.vlgmr.msra.gmra.mxu1 %vm150_vm2, %v3245_v10  ;;  %v499_v24 = vsel %vm150_vm2, %v494_v22, 0 }
 0x157   :  { %2743 = vmatpush3.bf16.xpose.msra.mxu1 %v267_v19  ;;  %2744 = vmatprep.mubr.msk.bf16.mxu1 %vm3083_vm0, %v3082_v0 }
 0x158   :  { %2754 = vmatprep.subr.bf16.mxu1 %v3082_v0 }
 0x159   :  { %v610_v25 = vpop.permute.xlu1 %609  ;;  %v492_v26 = vpop.permute.xlu0 %491 }
 0x15a   :  { %v615_v27 = vsel %vm150_vm2, %v610_v25, 0 }
 0x15d   :  { %v721_v28 = vpop.permute.xlu0 %720  ;;  %v719_v31 = vpop.permute.xlu1 %718 }
 0x15e   :  { %2745 = vmatmul.mubr.msk.bf16.vlgmr.msra.gmra.mxu1 %vm150_vm2, %v260_v18  ;;  %v726_v29 = vsel %vm150_vm2, %v721_v28, 0 }
 0x15f   :  { %2755 = vmatpush3.bf16.xpose.msra.mxu1 %v383_v21  ;;  %2756 = vmatprep.mubr.msk.bf16.mxu1 %vm3083_vm0, %v3082_v0 }
 0x160   :  { %2766 = vmatprep.subr.bf16.mxu1 %v3082_v0 }
 0x161   :  { %v836_v30 = vpop.permute.xlu0 %835  ;;  %v834_v34 = vpop.permute.xlu1 %833 }
 0x162   :  { %v841_v32 = vsel %vm150_vm2, %v836_v30, 0 }
 0x165   :  { %v951_v33 = vpop.permute.xlu0 %950  ;;  %v949_v36 = vpop.permute.xlu1 %948 }
 0x166   :  { %2757 = vmatmul.mubr.msk.bf16.vlgmr.msra.gmra.mxu1 %vm150_vm2, %v376_v23  ;;  %v956_v35 = vsel %vm150_vm2, %v951_v33, 0 }
 0x167   :  { %2767 = vmatpush3.bf16.xpose.msra.mxu1 %v499_v24  ;;  %2768 = vmatprep.mubr.msk.bf16.mxu1 %vm3083_vm0, %v3082_v0 }
 0x168   :  { %2778 = vmatprep.subr.bf16.mxu1 %v3082_v0 }
 0x16e   :  { %2769 = vmatmul.mubr.msk.bf16.vlgmr.msra.gmra.mxu1 %vm150_vm2, %v492_v26 }
 0x16f   :  { %2779 = vmatpush3.bf16.xpose.msra.mxu1 %v615_v27  ;;  %2780 = vmatprep.mubr.msk.bf16.mxu1 %vm3083_vm0, %v3082_v0 }
 0x170   :  { %2790 = vmatprep.subr.bf16.mxu1 %v3082_v0 }
 0x176   :  { %2781 = vmatmul.mubr.msk.bf16.vlgmr.msra.gmra.mxu1 %vm150_vm2, %v3259_v14 }
 0x177   :  { %2791 = vmatpush3.bf16.xpose.msra.mxu1 %v726_v29  ;;  %2792 = vmatprep.mubr.msk.bf16.mxu1 %vm3083_vm0, %v3082_v0 }
 0x178   :  { %2802 = vmatprep.subr.bf16.mxu1 %v3082_v0 }
 0x17e   :  { %2793 = vmatmul.mubr.msk.bf16.vlgmr.msra.gmra.mxu1 %vm150_vm2, %v719_v31 }
 0x17f   :  { %2803 = vmatpush3.bf16.xpose.msra.mxu1 %v841_v32  ;;  %2804 = vmatprep.mubr.msk.bf16.mxu1 %vm3083_vm0, %v3082_v0 }
 0x180   :  { %2814 = vmatprep.subr.bf16.mxu1 %v3082_v0 }
 0x186   :  { %2805 = vmatmul.mubr.msk.bf16.vlgmr.msra.gmra.mxu1 %vm150_vm2, %v834_v34 }
 0x187   :  { %2815 = vmatpush3.bf16.xpose.msra.mxu1 %v956_v35  ;;  %2816 = vmatprep.mubr.msk.bf16.mxu1 %vm3083_vm0, %v3082_v0 }
 0x188   :  { %2826 = vmatprep.subr.bf16.mxu1 %v3082_v0 }
 0x18e   :  { %2817 = vmatmul.mubr.msk.bf16.vlgmr.msra.gmra.mxu1 %vm150_vm2, %v949_v36 }
 0x18f   :  { %2830 = vmatprep.mubr.msk.bf16.mxu1 %vm3083_vm0, %v3082_v0 }
 0x216   :  { %v191_v37 = vpop.f32.mrf.mxu1 }
 0x217   :  { %v197_v38 = vsel %vm150_vm2, %v191_v37, -inf }
 0x218   :  { %198 = vmax.xlane.f32.xlu0 %v197_v38  ;;  %v2734_v39 = vpop.f32.mrf.mxu1 }
 0x21a   :  { %v194_v40 = vpop.f32.mrf.mxu1 }
 0x21c   :  { %v2735_v41 = vpop.f32.mrf.mxu1 }
 0x21e   :  { %v303_v42 = vpop.f32.mrf.mxu1 }
 0x21f   :  { %v309_v43 = vsel %vm150_vm2, %v303_v42, -inf }
 0x220   :  { %310 = vmax.xlane.f32.xlu1 %v309_v43  ;;  %v2746_v44 = vpop.f32.mrf.mxu1 }
 0x222   :  { %v306_v45 = vpop.f32.mrf.mxu1 }
 0x224   :  { %v2747_v46 = vpop.f32.mrf.mxu1 }
 0x226   :  { %v419_v47 = vpop.f32.mrf.mxu1 }
 0x227   :  { %v425_v48 = vsel %vm150_vm2, %v419_v47, -inf }
 0x228   :  { %426 = vmax.xlane.f32.xlu0 %v425_v48  ;;  %v2758_v49 = vpop.f32.mrf.mxu1 }
 0x22a   :  { %v422_v50 = vpop.f32.mrf.mxu1 }
 0x22c   :  { %v2759_v51 = vpop.f32.mrf.mxu1 }
 0x22e   :  { %v3322_v52 = vpop.f32.mrf.mxu1 }
 0x22f   :  { %v541_v53 = vsel %vm150_vm2, %v3322_v52, -inf }
 0x230   :  { %542 = vmax.xlane.f32.xlu0 %v541_v53  ;;  %v2770_v54 = vpop.f32.mrf.mxu1 }
 0x232   :  { %v538_v55 = vpop.f32.mrf.mxu1 }
 0x234   :  { %v2771_v56 = vpop.f32.mrf.mxu1 }
 0x236   :  { %v3326_v57 = vpop.f32.mrf.mxu1 }
 0x237   :  { %v657_v58 = vsel %vm150_vm2, %v3326_v57, -inf }
 0x238   :  { %658 = vmax.xlane.f32.xlu1 %v657_v58  ;;  %v2782_v59 = vpop.f32.mrf.mxu1 }
 0x23a   :  { %v654_v60 = vpop.f32.mrf.mxu1 }
 0x23c   :  { %v2783_v61 = vpop.f32.mrf.mxu1 }
 0x23e   :  { %v3330_v62 = vpop.f32.mrf.mxu1 }
 0x23f   :  { %v768_v63 = vsel %vm150_vm2, %v3330_v62, -inf }
 0x240   :  { %769 = vmax.xlane.f32.xlu0 %v768_v63  ;;  %v2794_v1 = vpop.f32.mrf.mxu1 }
 0x242   :  { %v765_v2 = vpop.f32.mrf.mxu1 }
 0x244   :  { %v2795_v5 = vpop.f32.mrf.mxu1 }
 0x246   :  { %v877_v6 = vpop.f32.mrf.mxu1 }
 0x247   :  { %v883_v7 = vsel %vm150_vm2, %v877_v6, -inf }
 0x248   :  { %884 = vmax.xlane.f32.xlu1 %v883_v7  ;;  %v2806_v8 = vpop.f32.mrf.mxu1 }
 0x24a   :  { %v880_v9 = vpop.f32.mrf.mxu1 }
 0x24c   :  { %v2807_v11 = vpop.f32.mrf.mxu1 }
 0x24e   :  { %v3335_v12 = vpop.f32.mrf.mxu1 }
 0x24f   :  { %v998_v17 = vsel %vm150_vm2, %v3335_v12, -inf }
 0x250   :  { %v2818_v13 = vpop.f32.mrf.mxu1 }
 0x252   :  { %v995_v15 = vpop.f32.mrf.mxu1 }
 0x254   :  { %v2819_v16 = vpop.f32.mrf.mxu1 }
 0x256   :  { %321 = vrot.lane.b32.xlu0 %v3245_v10, %s3091_s2 }
 0x259   :  { %209 = vrot.lane.b32.xlu1 %v3245_v10, %s3092_s23 }
 0x275   :  { %999 = vmax.xlane.f32.xlu0 %v998_v17 }
 0x2a1   :  { %v199_v18 = vpop.xlane.xlu0 %198 }
 0x2a2   :  { %v200_v19 = vsub.f32 %v191_v37, %v199_v18 }
 0x2a4   :  { %v201_v20 = vmul.f32 1.442695, %v200_v19 }
 0x2a6   :  { %3006 = vpow2.f32 %v201_v20 }
 0x2a9   :  { %v311_v21 = vpop.xlane.xlu1 %310 }
 0x2aa   :  { %v312_v22 = vsub.f32 %v303_v42, %v311_v21 }
 0x2ac   :  { %v313_v23 = vmul.f32 1.442695, %v312_v22 }
 0x2ae   :  { %3008 = vpow2.f32 %v313_v23 }
 0x2b1   :  { %v427_v24 = vpop.xlane.xlu0 %426 }
 0x2b2   :  { %v428_v25 = vsub.f32 %v419_v47, %v427_v24 }
 0x2b3   :  { %v3343_v26 = vpop.eup %3006 }
 0x2b4   :  { %v429_v27 = vmul.f32 1.442695, %v428_v25  ;;  %v203_v28 = vsel %vm150_vm2, %v3343_v26, 0.0 }
 0x2b5   :  { %204 = vadd.xlane.f32.xlu1 %v203_v28 }
 0x2b6   :  { %3010 = vpow2.f32 %v429_v27 }
 0x2b9   :  { %v543_v36 = vpop.xlane.xlu0 %542 }
 0x2ba   :  { %v544_v38 = vsub.f32 %v3322_v52, %v543_v36 }
 0x2bb   :  { %v3347_v29 = vpop.eup %3008 }
 0x2bc   :  { %v315_v30 = vsel %vm150_vm2, %v3347_v29, 0.0  ;;  %v545_v39 = vmul.f32 1.442695, %v544_v38 }
 0x2bd   :  { %316 = vadd.xlane.f32.xlu0 %v315_v30 }
 0x2be   :  { %3012 = vpow2.f32 %v545_v39 }
 0x2c1   :  { %v659_v33 = vpop.xlane.xlu1 %658 }
 0x2c2   :  { %v660_v40 = vsub.f32 %v3326_v57, %v659_v33 }
 0x2c3   :  { %v3351_v31 = vpop.eup %3010 }
 0x2c4   :  { %v431_v32 = vsel %vm150_vm2, %v3351_v31, 0.0  ;;  %v661_v43 = vmul.f32 1.442695, %v660_v40 }
 0x2c5   :  { %432 = vadd.xlane.f32.xlu1 %v431_v32 }
 0x2c6   :  { %3014 = vpow2.f32 %v661_v43 }
 0x2c9   :  { %v770_v41 = vpop.xlane.xlu0 %769 }
 0x2ca   :  { %v771_v42 = vsub.f32 %v3330_v62, %v770_v41 }
 0x2cc   :  { %v772_v45 = vmul.f32 1.442695, %v771_v42 }
 0x2cd   :  { %v322_v54 = vpop.permute.xlu0 %321 }
 0x2ce   :  { %3016 = vpow2.f32 %v772_v45  ;;  %v327_v5 = vsel %vm214_vm3, %v322_v54, 0 }
 0x2d1   :  { %v885_v34 = vpop.xlane.xlu1 %884 }
 0x2d2   :  { %v886_v44 = vsub.f32 %v877_v6, %v885_v34 }
 0x2d3   :  { %437 = vrot.lane.b32.xlu0 %v3245_v10, %s3093_s0 }
 0x2d4   :  { %v887_v46 = vmul.f32 1.442695, %v886_v44 }
 0x2d5   :  { %v210_v35 = vpop.permute.xlu1 %209 }
 0x2d6   :  { %553 = vrot.lane.b32.xlu1 %v3245_v10, %s3094_s8  ;;  %v216_v37 = vsel %vm214_vm3, %v210_v35, 0  ;;  %3018 = vpow2.f32 %v887_v46  ;;  %v3013_v10 = vpop.eup %3012 }
 0x2d7   :  { %2737 = vmatpush3.bf16.msra.mxu0 %v216_v37  ;;  %v547_v47 = vsel %vm150_vm2, %v3013_v10, 0.0  ;;  %v3365_v48 = vpop.eup %3014 }
 0x2d8   :  { %2748 = vmatprep.subr.bf16.mxu0 %v3082_v0  ;;  %v663_v50 = vsel %vm150_vm2, %v3365_v48, 0.0 }
 0x2db   :  { %v3367_v49 = vpop.eup %3016 }
 0x2dc   :  { %v774_v52 = vsel %vm150_vm2, %v3367_v49, 0.0 }
 0x2e3   :  { %v3371_v51 = vpop.eup %3018 }
 0x2e4   :  { %v889_v53 = vsel %vm150_vm2, %v3371_v51, 0.0 }
 0x2f2   :  { %548 = vadd.xlane.f32.xlu0 %v547_v47 }
 0x2f6   :  { %664 = vadd.xlane.f32.xlu0 %v663_v50 }
 0x2fa   :  { %775 = vadd.xlane.f32.xlu1 %v774_v52  ;;  %890 = vadd.xlane.f32.xlu0 %v889_v53 }
 0x2fe   :  { %v1000_v55 = vpop.xlane.xlu0 %999 }
 0x2ff   :  { %v1001_v56 = vsub.f32 %v3335_v12, %v1000_v55 }
 0x301   :  { %v1002_v57 = vmul.f32 1.442695, %v1001_v56 }
 0x303   :  { %3020 = vpow2.f32 %v1002_v57 }
 0x30b   :  { %780 = vrot.lane.b32.xlu1 %v3259_v14, %s3091_s2 }
 0x30f   :  { %895 = vrot.lane.b32.xlu1 %v3259_v14, %s3093_s0 }
 0x310   :  { %v3382_v58 = vpop.eup %3020 }
 0x311   :  { %v1004_v59 = vsel %vm150_vm2, %v3382_v58, 0.0 }
 0x312   :  { %1005 = vadd.xlane.f32.xlu0 %v1004_v59 }
 0x313   :  { %1010 = vrot.lane.b32.xlu1 %v3259_v14, %s3094_s8 }
 0x328   :  { %669 = vrot.lane.b32.xlu0 %v3259_v14, %s3092_s23  ;;  %s3826_s23 = sld [smem:[#allocation6_spill]] }
 0x33e   :  { %v205_v60 = vpop.xlane.xlu1 %204 }
 0x33f   :  { %3022 = vrcp.f32 %v205_v60 }
 0x346   :  { %v317_v61 = vpop.xlane.xlu0 %316 }
 0x347   :  { %3024 = vrcp.f32 %v317_v61 }
 0x34a   :  { %v438_v7 = vpop.permute.xlu0 %437 }
 0x34b   :  { %v443_v9 = vsel %vm214_vm3, %v438_v7, 0  ;;  %v2993_v7 = vld [vmem:[%s3826_s23] sm:$0xff]  }
 0x34c   :  { %v3023_v62 = vpop.eup %3022 }
 0x34d   :  { %v207_v63 = vmul.f32 %v3023_v62, %v3343_v26 }
 0x34e   :  { %v433_v1 = vpop.xlane.xlu1 %432 }
 0x34f   :  { %3026 = vrcp.f32 %v433_v1  ;;  %v208_v2 = vpack.c.bf16 %v207_v63, %v207_v63 }
 0x351   :  { %2739 = vmatmul.mubr.msk.bf16.vlgmr.msra.gmra.mxu0 %vm150_vm2, %v208_v2 }
 0x352   :  { %2749 = vmatpush3.bf16.msra.mxu0 %v327_v5  ;;  %2750 = vmatprep.mubr.msk.bf16.mxu0 %vm3083_vm0, %v3082_v0  ;;  %v554_v13 = vpop.permute.xlu1 %553 }
 0x353   :  { %2760 = vmatprep.subr.bf16.mxu0 %v3082_v0  ;;  %v559_v16 = vsel %vm214_vm3, %v554_v13, 0 }
 0x354   :  { %v3025_v14 = vpop.eup %3024 }
 0x355   :  { %v319_v6 = vmul.f32 %v3025_v14, %v3347_v29  ;;  %v2992_v14 = vld [vmem:[%s3826_s23 + $0x8] sm:$0xff]   ;;  %s3827_s23 = sld [smem:[#allocation7_spill]] }
 0x356   :  { %2827 = vmatpush3.bf16.msra.mxu1 %v2992_v14 }
 0x357   :  { %v320_v8 = vpack.c.bf16 %v319_v6, %v319_v6  ;;  %2828 = vmatprep.subr.bf16.mxu1 %v3082_v0 }
 0x359   :  { %2751 = vmatmul.mubr.msk.bf16.vlgmr.msra.gmra.mxu0 %vm150_vm2, %v320_v8 }
 0x35a   :  { %2761 = vmatpush3.bf16.msra.mxu0 %v443_v9  ;;  %2762 = vmatprep.mubr.msk.bf16.mxu0 %vm3083_vm0, %v3082_v0 }
 0x35b   :  { %2772 = vmatprep.subr.bf16.mxu0 %v3082_v0  ;;  %2829 = vmatpush3.bf16.msra.mxu1 %v2993_v7 }
 0x35c   :  { %v3027_v11 = vpop.eup %3026 }
 0x35d   :  { %v435_v12 = vmul.f32 %v3027_v11, %v3351_v31 }
 0x35f   :  { %v436_v15 = vpack.c.bf16 %v435_v12, %v435_v12 }
 0x361   :  { %2763 = vmatmul.mubr.msk.bf16.vlgmr.msra.gmra.mxu0 %vm150_vm2, %v436_v15 }
 0x362   :  { %2773 = vmatpush3.bf16.msra.mxu0 %v559_v16  ;;  %2774 = vmatprep.mubr.msk.bf16.mxu0 %vm3083_vm0, %v3082_v0 }
 0x363   :  { %2784 = vmatprep.subr.bf16.mxu0 %v3082_v0 }
 0x37b   :  { %v549_v17 = vpop.xlane.xlu0 %548 }
 0x37c   :  { %3028 = vrcp.f32 %v549_v17 }
 0x37f   :  { %v665_v20 = vpop.xlane.xlu0 %664 }
 0x380   :  { %3030 = vrcp.f32 %v665_v20 }
 0x383   :  { %v776_v22 = vpop.xlane.xlu1 %775  ;;  %v891_v23 = vpop.xlane.xlu0 %890 }
 0x384   :  { %3032 = vrcp.f32 %v776_v22 }
 0x385   :  { %3034 = vrcp.f32 %v891_v23 }
 0x387   :  { %v781_v29 = vpop.permute.xlu1 %780 }
 0x388   :  { %v786_v32 = vsel %vm214_vm3, %v781_v29, 0 }
 0x389   :  { %v3029_v18 = vpop.eup %3028 }
 0x38a   :  { %v551_v19 = vmul.f32 %v3029_v18, %v3013_v10 }
 0x38b   :  { %v896_v34 = vpop.permute.xlu1 %895 }
 0x38c   :  { %v552_v21 = vpack.c.bf16 %v551_v19, %v551_v19  ;;  %v901_v37 = vsel %vm214_vm3, %v896_v34, 0 }
 0x38d   :  { %v3031_v24 = vpop.eup %3030 }
 0x38e   :  { %2775 = vmatmul.mubr.msk.bf16.vlgmr.msra.gmra.mxu0 %vm150_vm2, %v552_v21  ;;  %v667_v26 = vmul.f32 %v3031_v24, %v3365_v48 }
 0x38f   :  { %2786 = vmatprep.mubr.msk.bf16.mxu0 %vm3083_vm0, %v3082_v0  ;;  %v1011_v39 = vpop.permute.xlu1 %1010 }
 0x390   :  { %v668_v30 = vpack.c.bf16 %v667_v26, %v667_v26  ;;  %v1016_v42 = vsel %vm214_vm3, %v1011_v39, 0 }
 0x391   :  { %v3033_v31 = vpop.eup %3032 }
 0x392   :  { %v778_v33 = vmul.f32 %v3033_v31, %v3367_v49  ;;  %v3035_v36 = vpop.eup %3034 }
 0x393   :  { %v893_v38 = vmul.f32 %v3035_v36, %v3371_v51 }
 0x394   :  { %v779_v35 = vpack.c.bf16 %v778_v33, %v778_v33 }
 0x395   :  { %v894_v40 = vpack.c.bf16 %v893_v38, %v893_v38  ;;  %v2994_v38 = vld [vmem:[%s3828_s26 + $0x8] sm:$0xff]  }
 0x396   :  { %2842 = vmatprep.subr.bf16.mxu1 %v2994_v38 }
 0x39b   :  { %v1006_v25 = vpop.xlane.xlu0 %1005 }
 0x39c   :  { %3036 = vrcp.f32 %v1006_v25 }
 0x39f   :  { %v670_v27 = vpop.permute.xlu0 %669 }
 0x3a0   :  { %v675_v28 = vsel %vm214_vm3, %v670_v27, 0  ;;  %v2585_v27 = vld [vmem:[%s3827_s23] ss:$0 sm:$0xff] }
 0x3a1   :  { %2785 = vmatpush3.bf16.msra.mxu0 %v675_v28 }
 0x3a2   :  { %2796 = vmatprep.subr.bf16.mxu0 %v3082_v0 }
 0x3a4   :  { %2787 = vmatmul.mubr.msk.bf16.vlgmr.msra.gmra.mxu0 %vm150_vm2, %v668_v30 }
 0x3a5   :  { %2797 = vmatpush3.bf16.msra.mxu0 %v786_v32  ;;  %2798 = vmatprep.mubr.msk.bf16.mxu0 %vm3083_vm0, %v3082_v0 }
 0x3a6   :  { %2808 = vmatprep.subr.bf16.mxu0 %v3082_v0 }
 0x3a9   :  { %v3037_v41 = vpop.eup %3036 }
 0x3aa   :  { %v1008_v43 = vmul.f32 %v3037_v41, %v3382_v58 }
 0x3ac   :  { %2799 = vmatmul.mubr.msk.bf16.vlgmr.msra.gmra.mxu0 %vm150_vm2, %v779_v35  ;;  %v1009_v44 = vpack.c.bf16 %v1008_v43, %v1008_v43 }
 0x3ad   :  { %2809 = vmatpush3.bf16.msra.mxu0 %v901_v37  ;;  %2810 = vmatprep.mubr.msk.bf16.mxu0 %vm3083_vm0, %v3082_v0 }
 0x3ae   :  { %2820 = vmatprep.subr.bf16.mxu0 %v3082_v0 }
 0x3b4   :  { %2811 = vmatmul.mubr.msk.bf16.vlgmr.msra.gmra.mxu0 %vm150_vm2, %v894_v40 }
 0x3b5   :  { %2821 = vmatpush3.bf16.msra.mxu0 %v1016_v42  ;;  %2822 = vmatprep.mubr.msk.bf16.mxu0 %vm3083_vm0, %v3082_v0 }
 0x3b6   :  { %2834 = vmatprep.subr.bf16.mxu0 %v3082_v0 }
 0x3bc   :  { %2823 = vmatmul.mubr.msk.bf16.vlgmr.msra.gmra.mxu0 %vm150_vm2, %v1009_v44 }
 0x3bd   :  { %2838 = vmatprep.mubr.msk.bf16.mxu0 %vm3083_vm0, %v3082_v0 }
 0x411   :  { %v252_v45 = vpop.f32.mrf.mxu0 }
 0x412   :  { %258 = vst.msk [vmem:[#allocation2] sm:$0xff] %vm150_vm2, %v252_v45 }
 0x413   :  { %v2740_v46 = vpop.f32.mrf.mxu0 }
 0x415   :  { %v255_v10 = vpop.f32.mrf.mxu0 }
 0x416   :  { %v2995_v10 = vld [vmem:[%s3828_s26] sm:$0xff]  }
 0x417   :  { %v2741_v47 = vpop.f32.mrf.mxu0 }
 0x419   :  { %v363_v48 = vpop.f32.mrf.mxu0 }
 0x41a   :  { %370 = vrot.lane.b32.xlu1 %v363_v48, %s3810_s24 }
 0x41b   :  { %v2752_v49 = vpop.f32.mrf.mxu0 }
 0x41d   :  { %v366_v50 = vpop.f32.mrf.mxu0 }
 0x41f   :  { %v2753_v51 = vpop.f32.mrf.mxu0 }
 0x421   :  { %v479_v52 = vpop.f32.mrf.mxu0 }
 0x422   :  { %486 = vrot.lane.b32.xlu0 %v479_v52, %s3808_s1  ;;  %v2996_v52 = vld [vmem:[%s3785_s6 + $0x8] sm:$0xff]  }
 0x423   :  { %v2764_v53 = vpop.f32.mrf.mxu0  ;;  %2835 = vmatpush3.bf16.msra.mxu0 %v2996_v52 }
 0x424   :  { %v2997_v53 = vld [vmem:[%s3785_s6] sm:$0xff]   ;;  %2836 = vmatprep.subr.bf16.mxu0 %v3082_v0 }
 0x425   :  { %v482_v54 = vpop.f32.mrf.mxu0 }
 0x427   :  { %v2765_v55 = vpop.f32.mrf.mxu0  ;;  %2837 = vmatpush3.bf16.msra.mxu0 %v2997_v53 }
 0x428   :  { %2850 = vmatprep.subr.bf16.mxu0 %v3082_v0 }
 0x44e   :  { %v595_v56 = vpop.f32.mrf.mxu0 }
 0x44f   :  { %602 = vrot.lane.b32.xlu0 %v595_v56, %s3806_s25 }
 0x450   :  { %v2776_v57 = vpop.f32.mrf.mxu0 }
 0x452   :  { %v598_v58 = vpop.f32.mrf.mxu0 }
 0x454   :  { %v2777_v59 = vpop.f32.mrf.mxu0 }
 0x464   :  { %v711_v60 = vpop.f32.mrf.mxu0 }
 0x465   :  { %717 = vst.msk [vmem:[#allocation2 + $0x8] sm:$0xff] %vm150_vm2, %v711_v60 }
 0x466   :  { %v2788_v61 = vpop.f32.mrf.mxu0 }
 0x468   :  { %v714_v62 = vpop.f32.mrf.mxu0 }
 0x469   :  { %v2589_v62 = vld [vmem:[%s3786_s16] ss:$0 sm:$0xff] }
 0x46a   :  { %v2789_v63 = vpop.f32.mrf.mxu0 }
 0x46c   :  { %v822_v1 = vpop.f32.mrf.mxu0 }
 0x46d   :  { %829 = vrot.lane.b32.xlu1 %v822_v1, %s3810_s24 }
 0x46e   :  { %v2800_v2 = vpop.f32.mrf.mxu0 }
 0x470   :  { %v825_v5 = vpop.f32.mrf.mxu0 }
 0x471   :  { %v2590_v5 = vld [vmem:[%s3787_s17] ss:$0 sm:$0xff] }
 0x472   :  { %v2801_v6 = vpop.f32.mrf.mxu0 }
 0x474   :  { %v937_v8 = vpop.f32.mrf.mxu0 }
 0x475   :  { %944 = vrot.lane.b32.xlu1 %v937_v8, %s3808_s1 }
 0x476   :  { %v2812_v9 = vpop.f32.mrf.mxu0 }
 0x478   :  { %v940_v11 = vpop.f32.mrf.mxu0 }
 0x479   :  { %v2595_v11 = vld [vmem:[%s3788_s9] ss:$0 sm:$0xff] }
 0x47a   :  { %v2813_v12 = vpop.f32.mrf.mxu0 }
 0x47c   :  { %v1052_v13 = vpop.f32.mrf.mxu0 }
 0x47d   :  { %1059 = vrot.lane.b32.xlu1 %v1052_v13, %s3806_s25  ;;  %s3829_s25 = sld [smem:[#allocation9_spill]] }
 0x47e   :  { %v2824_v15 = vpop.f32.mrf.mxu0 }
 0x480   :  { %v1055_v16 = vpop.f32.mrf.mxu0 }
 0x482   :  { %v2825_v17 = vpop.f32.mrf.mxu0 }
 0x483   :  { %v74_v47 = vld [vmem:[%s3829_s25] sm:$0xff]  ;;  %v75_v48 = vld [vmem:[%s3829_s25 + $0x8] sm:$0xff]  ;;  %v76_v50 = vld [vmem:[%s3829_s25 + $0x10] sm:$0xf] }
 0x484   :  { %v1248_v49 = vpack.c.bf16 %v75_v48, %v74_v47  ;;  %v1249_v51 = vpack.c.bf16 %v76_v50, %v76_v50 }
 0x48c   :  { %v371_v18 = vpop.permute.xlu1 %370 }
 0x48d   :  { %374 = vst.msk [vmem:[#allocation2] sm:$0xff] %vm373_vm4, %v371_v18 }
 0x494   :  { %v487_v19 = vpop.permute.xlu0 %486 }
 0x495   :  { %490 = vst.msk [vmem:[#allocation2] sm:$0xff] %vm489_vm5, %v487_v19 }
 0x4c1   :  { %v603_v20 = vpop.permute.xlu0 %602 }
 0x4c2   :  { %606 = vst.msk [vmem:[#allocation2] sm:$0xff] %vm605_vm6, %v603_v20 }
 0x4c9   :  { %v1063_v24 = vld [vmem:[#allocation2] sm:$0xff] }
 0x4df   :  { %v830_v21 = vpop.permute.xlu1 %829 }
 0x4e0   :  { %832 = vst.msk [vmem:[#allocation2 + $0x8] sm:$0xff] %vm373_vm4, %v830_v21 }
 0x4e7   :  { %v945_v22 = vpop.permute.xlu1 %944 }
 0x4e8   :  { %947 = vst.msk [vmem:[#allocation2 + $0x8] sm:$0xff] %vm489_vm5, %v945_v22  ;;  %v2591_v22 = vld [vmem:[%s3789_s7] ss:$0 sm:$0xff]  ;;  %s3830_s7 = smov 80  }
 0x4ef   :  { %v1060_v23 = vpop.permute.xlu1 %1059 }
 0x4f0   :  { %1062 = vst.msk [vmem:[#allocation2 + $0x8] sm:$0xff] %vm605_vm6, %v1060_v23 }
 0x4f7   :  { %v1064_v25 = vld [vmem:[#allocation2 + $0x8] sm:$0xff] }
 0x4f8   :  { %v1065_v26 = vpack.c.bf16 %v1064_v25, %v1063_v24 }
 0x4fa   :  { %2831 = vmatmul.mubr.msk.bf16.vlgmr.msra.gmra.mxu1 %vm101_vm1, %v1065_v26 }
 0x4fb   :  { %2843 = vmatpush3.bf16.msra.mxu1 %v2994_v38  ;;  %2846 = vmatprep.mubr.msk.bf16.mxu1 %vm101_vm1, %v1248_v49 }
 0x4fc   :  { %2844 = vmatprep.subr.bf16.mxu1 %v2995_v10 }
 0x4ff   :  { %2845 = vmatpush3.bf16.msra.mxu1 %v2995_v10 }
 0x500   :  { %2856 = vmatprep.subr.bf16.mxu1 %v3082_v0 }
 0x502   :  { %2847 = vmatmul.mubr.msk.bf16.vlgmr.msra.gmra.mxu1 %vm101_vm1, %v1249_v51 }
 0x503   :  { %2858 = vmatprep.mubr.msk.bf16.mxu1 %vm3083_vm0, %v3082_v0 }
 0x5ba   :  { %v1126_v28 = vpop.f32.mrf.mxu1 }
 0x5bb   :  { %v1127_v29 = vadd.f32 %v2585_v27, %v1126_v28 }
 0x5bc   :  { %v2832_v30 = vpop.f32.mrf.mxu1 }
 0x5bd   :  { %v1133_v31 = vadd.f32 %v1127_v29, %v3228_v3 }
 0x5be   :  { %v1129_v32 = vpop.f32.mrf.mxu1 }
 0x5bf   :  { %v1130_v33 = vadd.f32 %v2585_v27, %v1129_v32  ;;  %v1135_v34 = vsel %vm101_vm1, %v1133_v31, 0.0 }
 0x5c0   :  { %1136 = vadd.xlane.f32.xlu0 %v1135_v34  ;;  %v2833_v35 = vpop.f32.mrf.mxu1 }
 0x5c1   :  { %v1134_v36 = vadd.f32 %v1130_v33, %v3233_v4 }
 0x5c2   :  { %v2848_v9 = vpop.f32.mrf.mxu1 }
 0x5c3   :  { %v1138_v37 = vsel %vm101_vm1, %v1134_v36, 0.0  ;;  %v1322_v12 = vadd.f32 %v2848_v9, %v2595_v11 }
 0x5c4   :  { %1139 = vadd.xlane.f32.xlu1 %v1138_v37  ;;  %v1313_v13 = vpop.f32.mrf.mxu1 }
 0x5c5   :  { %v1314_v16 = vadd.f32 %v2595_v11, %v1313_v13 }
 0x5c6   :  { %v2849_v15 = vpop.f32.mrf.mxu1 }
 0x5c8   :  { %v1316_v17 = vpop.f32.mrf.mxu1 }
 0x5c9   :  { %v1317_v18 = vadd.f32 %v2595_v11, %v1316_v17 }
 0x5cb   :  { %v3512_v19 = vpack.c.bf16 %v1317_v18, %v1314_v16  ;;  %v1786_v20 = vpack.c.bf16 %v1322_v12, %v1317_v18 }
 0x5cd   :  { %v1333_v21 = vsel %vm150_vm2, %v3512_v19, 0  ;;  %v3534_v32 = vrot.slane %v1786_v20, 1 }
 0x5d5   :  { %1442 = vrot.lane.b32.xlu1 %v3512_v19, %s3084_s3 }
 0x5d9   :  { %1557 = vrot.lane.b32.xlu1 %v3512_v19, %s3089_s30 }
 0x649   :  { %v1137_v39 = vpop.xlane.xlu0 %1136 }
 0x64a   :  { %v1142_v40 = vmul.f32 0.03125, %v1137_v39 }
 0x64c   :  { %v1144_v3 = vsub.f32 %v1133_v31, %v1142_v40 }
 0x64d   :  { %v1140_v41 = vpop.xlane.xlu1 %1139 }
 0x64e   :  { %v1143_v42 = vmul.f32 0.03125, %v1140_v41  ;;  %v1146_v43 = vmul.f32 %v1144_v3, %v1144_v3 }
 0x650   :  { %v1145_v44 = vsub.f32 %v1134_v36, %v1143_v42  ;;  %v1148_v45 = vsel %vm101_vm1, %v1146_v43, 0.0 }
 0x651   :  { %1149 = vadd.xlane.f32.xlu0 %v1148_v45  ;;  %v1443_v27 = vpop.permute.xlu1 %1442 }
 0x652   :  { %v1147_v4 = vmul.f32 %v1145_v44, %v1145_v44  ;;  %v1448_v29 = vsel %vm150_vm2, %v1443_v27, 0 }
 0x654   :  { %v1151_v46 = vsel %vm101_vm1, %v1147_v4, 0.0 }
 0x655   :  { %1152 = vadd.xlane.f32.xlu0 %v1151_v46  ;;  %v1558_v34 = vpop.permute.xlu1 %1557 }
 0x656   :  { %v1563_v36 = vsel %vm150_vm2, %v1558_v34, 0 }
 0x6da   :  { %v1150_v54 = vpop.xlane.xlu0 %1149 }
 0x6db   :  { %v1154_v55 = vmul.f32 0.03125, %v1150_v54 }
 0x6dd   :  { %v1156_v56 = vadd.f32 1e-05, %v1154_v55 }
 0x6de   :  { %v1153_v57 = vpop.xlane.xlu0 %1152 }
 0x6df   :  { %3038 = vrsqrt.f32 %v1156_v56  ;;  %v1155_v58 = vmul.f32 0.03125, %v1153_v57 }
 0x6e1   :  { %v1157_v59 = vadd.f32 1e-05, %v1155_v58 }
 0x6e3   :  { %3040 = vrsqrt.f32 %v1157_v59 }
 0x6ec   :  { %v3039_v60 = vpop.eup %3038 }
 0x6ed   :  { %v1160_v61 = vmul.f32 %v3039_v60, %v1144_v3  ;;  %v1793_v3 = vsel %vm150_vm2, %v3534_v32, 0 }
 0x6ef   :  { %v1169_v2 = vmul.f32 %v2589_v62, %v1160_v61 }
 0x6f0   :  { %v3041_v63 = vpop.eup %3040 }
 0x6f1   :  { %v1161_v1 = vmul.f32 %v3041_v63, %v1145_v44  ;;  %v3500_v6 = vadd.f32 %v2590_v5, %v1169_v2 }
 0x6f3   :  { %v1170_v14 = vmul.f32 %v2589_v62, %v1161_v1 }
 0x6f5   :  { %v3502_v7 = vadd.f32 %v2590_v5, %v1170_v14 }
 0x6f7   :  { %v1180_v8 = vpack.c.bf16 %v3502_v7, %v3500_v6 }
 0x6f9   :  { %2839 = vmatmul.mubr.msk.bf16.vlgmr.msra.gmra.mxu0 %vm101_vm1, %v1180_v8 }
 0x6fa   :  { %2852 = vmatprep.mubr.msk.bf16.mxu0 %vm3083_vm0, %v3082_v0  ;;  %2851 = vmatpush3.bf16.xpose.msra.mxu0 %v1333_v21 }
 0x6fb   :  { %2862 = vmatprep.subr.bf16.mxu0 %v3082_v0 }
 0x7b9   :  { %v1241_v23 = vpop.f32.mrf.mxu0 }
 0x7ba   :  { %v1242_v24 = vadd.f32 %v2591_v22, %v1241_v23 }
 0x7bb   :  { %v2840_v25 = vpop.f32.mrf.mxu0 }
 0x7bc   :  { %v1327_v26 = vpack.c.bf16 %v1242_v24, %v1242_v24 }
 0x7bd   :  { %v1244_v28 = vpop.f32.mrf.mxu0 }
 0x7be   :  { %1440 = vrot.lane.b32.xlu0 %v1327_v26, %s3084_s3  ;;  %1555 = vrot.lane.b32.xlu1 %v1327_v26, %s3089_s30  ;;  %v1245_v31 = vadd.f32 %v2591_v22, %v1244_v28 }
 0x7bf   :  { %2853 = vmatmul.mubr.msk.bf16.vlgmr.msra.gmra.mxu0 %vm150_vm2, %v1327_v26  ;;  %v2841_v30 = vpop.f32.mrf.mxu0 }
 0x7c0   :  { %2863 = vmatpush3.bf16.xpose.msra.mxu0 %v1448_v29  ;;  %2864 = vmatprep.mubr.msk.bf16.mxu0 %vm3083_vm0, %v3082_v0  ;;  %v1785_v33 = vpack.c.bf16 %v1245_v31, %v1245_v31 }
 0x7c1   :  { %2874 = vmatprep.subr.bf16.mxu0 %v3082_v0 }
 0x7c2   :  { %1672 = vrot.lane.b32.xlu0 %v3512_v19, %s3090_s5  ;;  %1670 = vrot.lane.b32.xlu1 %v1327_v26, %s3090_s5 }
 0x7c6   :  { %1899 = vrot.lane.b32.xlu0 %v3534_v32, %s3084_s3  ;;  %1897 = vrot.lane.b32.xlu1 %v1785_v33, %s3084_s3  ;;  %s3831_s3 = smov 72  }
 0x7ca   :  { %2014 = vrot.lane.b32.xlu0 %v3534_v32, %s3089_s30  ;;  %2012 = vrot.lane.b32.xlu1 %v1785_v33, %s3089_s30  ;;  %s3834_s30 = smov 24  }
 0x7ce   :  { %2129 = vrot.lane.b32.xlu0 %v3534_v32, %s3090_s5  ;;  %2127 = vrot.lane.b32.xlu1 %v1785_v33, %s3090_s5 }
 0x830   :  { %v1441_v35 = vpop.permute.xlu0 %1440  ;;  %v1556_v38 = vpop.permute.xlu1 %1555 }
 0x831   :  { %2865 = vmatmul.mubr.msk.bf16.vlgmr.msra.gmra.mxu0 %vm150_vm2, %v1441_v35 }
 0x832   :  { %2875 = vmatpush3.bf16.xpose.msra.mxu0 %v1563_v36  ;;  %2876 = vmatprep.mubr.msk.bf16.mxu0 %vm3083_vm0, %v3082_v0 }
 0x833   :  { %2886 = vmatprep.subr.bf16.mxu0 %v3082_v0 }
 0x834   :  { %v1673_v37 = vpop.permute.xlu0 %1672  ;;  %v1671_v40 = vpop.permute.xlu1 %1670 }
 0x835   :  { %v1678_v39 = vsel %vm150_vm2, %v1673_v37, 0 }
 0x838   :  { %v1900_v41 = vpop.permute.xlu0 %1899  ;;  %v1898_v44 = vpop.permute.xlu1 %1897 }
 0x839   :  { %2877 = vmatmul.mubr.msk.bf16.vlgmr.msra.gmra.mxu0 %vm150_vm2, %v1556_v38  ;;  %v1905_v42 = vsel %vm150_vm2, %v1900_v41, 0 }
 0x83a   :  { %2887 = vmatpush3.bf16.xpose.msra.mxu0 %v1678_v39  ;;  %2888 = vmatprep.mubr.msk.bf16.mxu0 %vm3083_vm0, %v3082_v0 }
 0x83b   :  { %2898 = vmatprep.subr.bf16.mxu0 %v3082_v0 }
 0x83c   :  { %v2015_v43 = vpop.permute.xlu0 %2014  ;;  %v2013_v46 = vpop.permute.xlu1 %2012 }
 0x83d   :  { %v2020_v45 = vsel %vm150_vm2, %v2015_v43, 0 }
 0x840   :  { %v2130_v4 = vpop.permute.xlu0 %2129  ;;  %v2128_v47 = vpop.permute.xlu1 %2127 }
 0x841   :  { %2889 = vmatmul.mubr.msk.bf16.vlgmr.msra.gmra.mxu0 %vm150_vm2, %v1671_v40  ;;  %v2135_v10 = vsel %vm150_vm2, %v2130_v4, 0 }
 0x842   :  { %2899 = vmatpush3.bf16.xpose.msra.mxu0 %v1793_v3  ;;  %2900 = vmatprep.mubr.msk.bf16.mxu0 %vm3083_vm0, %v3082_v0 }
 0x843   :  { %2910 = vmatprep.subr.bf16.mxu0 %v3082_v0 }
 0x849   :  { %2901 = vmatmul.mubr.msk.bf16.vlgmr.msra.gmra.mxu0 %vm150_vm2, %v1785_v33 }
 0x84a   :  { %2911 = vmatpush3.bf16.xpose.msra.mxu0 %v1905_v42  ;;  %2912 = vmatprep.mubr.msk.bf16.mxu0 %vm3083_vm0, %v3082_v0 }
 0x84b   :  { %2922 = vmatprep.subr.bf16.mxu0 %v3082_v0 }
 0x851   :  { %2913 = vmatmul.mubr.msk.bf16.vlgmr.msra.gmra.mxu0 %vm150_vm2, %v1898_v44 }
 0x852   :  { %2923 = vmatpush3.bf16.xpose.msra.mxu0 %v2020_v45  ;;  %2924 = vmatprep.mubr.msk.bf16.mxu0 %vm3083_vm0, %v3082_v0 }
 0x853   :  { %2934 = vmatprep.subr.bf16.mxu0 %v3082_v0 }
 0x859   :  { %2925 = vmatmul.mubr.msk.bf16.vlgmr.msra.gmra.mxu0 %vm150_vm2, %v2013_v46 }
 0x85a   :  { %2935 = vmatpush3.bf16.xpose.msra.mxu0 %v2135_v10  ;;  %2936 = vmatprep.mubr.msk.bf16.mxu0 %vm3083_vm0, %v3082_v0 }
 0x85b   :  { %2946 = vmatprep.subr.bf16.mxu0 %v3082_v0 }
 0x861   :  { %2937 = vmatmul.mubr.msk.bf16.vlgmr.msra.gmra.mxu0 %vm150_vm2, %v2128_v47 }
 0x862   :  { %2950 = vmatprep.mubr.msk.bf16.mxu0 %vm3083_vm0, %v3082_v0 }
 0x87f   :  { %v1369_v48 = vpop.f32.mrf.mxu0 }
 0x880   :  { %v1376_v49 = vsel %vm1375_vm7, %v1369_v48, -inf }
 0x881   :  { %1377 = vmax.xlane.f32.xlu0 %v1376_v49  ;;  %v2854_v50 = vpop.f32.mrf.mxu0 }
 0x883   :  { %v1372_v51 = vpop.f32.mrf.mxu0 }
 0x885   :  { %v2855_v52 = vpop.f32.mrf.mxu0 }
 0x8f1   :  { %v1484_v53 = vpop.f32.mrf.mxu0 }
 0x8f2   :  { %v1490_v54 = vsel %vm1375_vm7, %v1484_v53, -inf }
 0x8f3   :  { %1491 = vmax.xlane.f32.xlu1 %v1490_v54  ;;  %v2866_v55 = vpop.f32.mrf.mxu0 }
 0x8f5   :  { %v1487_v56 = vpop.f32.mrf.mxu0 }
 0x8f7   :  { %v2867_v57 = vpop.f32.mrf.mxu0 }
 0x8f9   :  { %v1599_v58 = vpop.f32.mrf.mxu0 }
 0x8fa   :  { %v1605_v59 = vsel %vm1375_vm7, %v1599_v58, -inf }
 0x8fb   :  { %1606 = vmax.xlane.f32.xlu0 %v1605_v59  ;;  %v2878_v60 = vpop.f32.mrf.mxu0 }
 0x8fd   :  { %v1602_v61 = vpop.f32.mrf.mxu0 }
 0x8ff   :  { %v2879_v62 = vpop.f32.mrf.mxu0 }
 0x901   :  { %v3582_v63 = vpop.f32.mrf.mxu0 }
 0x902   :  { %v1720_v1 = vsel %vm1375_vm7, %v3582_v63, -inf }
 0x903   :  { %1721 = vmax.xlane.f32.xlu0 %v1720_v1  ;;  %v2890_v2 = vpop.f32.mrf.mxu0 }
 0x905   :  { %v1717_v5 = vpop.f32.mrf.mxu0 }
 0x907   :  { %v2891_v14 = vpop.f32.mrf.mxu0 }
 0x909   :  { %v3586_v8 = vpop.f32.mrf.mxu0 }
 0x90a   :  { %v1835_v9 = vsel %vm1375_vm7, %v3586_v8, -inf  ;;  %v1378_v30 = vpop.xlane.xlu0 %1377 }
 0x90b   :  { %1836 = vmax.xlane.f32.xlu1 %v1835_v9  ;;  %v2902_v11 = vpop.f32.mrf.mxu0  ;;  %v1379_v31 = vsub.f32 %v1369_v48, %v1378_v30 }
 0x90d   :  { %v1832_v12 = vpop.f32.mrf.mxu0  ;;  %v1380_v33 = vmul.f32 1.442695, %v1379_v31 }
 0x90f   :  { %v2903_v13 = vpop.f32.mrf.mxu0  ;;  %3042 = vpow2.f32 %v1380_v33 }
 0x911   :  { %v1941_v15 = vpop.f32.mrf.mxu0 }
 0x912   :  { %v1947_v16 = vsel %vm1375_vm7, %v1941_v15, -inf }
 0x913   :  { %1948 = vmax.xlane.f32.xlu0 %v1947_v16  ;;  %v2914_v17 = vpop.f32.mrf.mxu0 }
 0x915   :  { %v1944_v18 = vpop.f32.mrf.mxu0 }
 0x917   :  { %v2915_v20 = vpop.f32.mrf.mxu0 }
 0x919   :  { %v2056_v21 = vpop.f32.mrf.mxu0 }
 0x91a   :  { %v2062_v22 = vsel %vm1375_vm7, %v2056_v21, -inf }
 0x91b   :  { %2063 = vmax.xlane.f32.xlu1 %v2062_v22  ;;  %v2926_v23 = vpop.f32.mrf.mxu0 }
 0x91c   :  { %v3600_v35 = vpop.eup %3042 }
 0x91d   :  { %v2059_v24 = vpop.f32.mrf.mxu0  ;;  %v1382_v36 = vsel %vm1375_vm7, %v3600_v35, 0.0 }
 0x91f   :  { %v2927_v25 = vpop.f32.mrf.mxu0 }
 0x921   :  { %v3592_v26 = vpop.f32.mrf.mxu0 }
 0x922   :  { %v2177_v34 = vsel %vm1375_vm7, %v3592_v26, -inf }
 0x923   :  { %v2938_v27 = vpop.f32.mrf.mxu0 }
 0x925   :  { %v2174_v28 = vpop.f32.mrf.mxu0 }
 0x927   :  { %v2939_v29 = vpop.f32.mrf.mxu0 }
 0x929   :  { %1502 = vrot.lane.b32.xlu0 %v3512_v19, %s3087_s28 }
 0x92c   :  { %1389 = vrot.lane.b32.xlu1 %v3512_v19, %s3085_s27 }
 0x948   :  { %2178 = vmax.xlane.f32.xlu0 %v2177_v34 }
 0x950   :  { %1383 = vadd.xlane.f32.xlu1 %v1382_v36 }
 0x97c   :  { %v1492_v37 = vpop.xlane.xlu1 %1491 }
 0x97d   :  { %v1493_v38 = vsub.f32 %v1484_v53, %v1492_v37 }
 0x97f   :  { %v1494_v39 = vmul.f32 1.442695, %v1493_v38 }
 0x981   :  { %3044 = vpow2.f32 %v1494_v39 }
 0x984   :  { %v1607_v40 = vpop.xlane.xlu0 %1606 }
 0x985   :  { %v1608_v3 = vsub.f32 %v1599_v58, %v1607_v40 }
 0x987   :  { %v1609_v41 = vmul.f32 1.442695, %v1608_v3 }
 0x989   :  { %3046 = vpow2.f32 %v1609_v41 }
 0x98c   :  { %v1722_v47 = vpop.xlane.xlu0 %1721 }
 0x98d   :  { %v1723_v49 = vsub.f32 %v3582_v63, %v1722_v47 }
 0x98e   :  { %v3604_v42 = vpop.eup %3044 }
 0x98f   :  { %v1496_v43 = vsel %vm1375_vm7, %v3604_v42, 0.0  ;;  %v1724_v50 = vmul.f32 1.442695, %v1723_v49 }
 0x990   :  { %1497 = vadd.xlane.f32.xlu0 %v1496_v43 }
 0x991   :  { %3048 = vpow2.f32 %v1724_v50 }
 0x994   :  { %v1837_v4 = vpop.xlane.xlu1 %1836 }
 0x995   :  { %v1838_v51 = vsub.f32 %v3586_v8, %v1837_v4 }
 0x996   :  { %v3608_v44 = vpop.eup %3046 }
 0x997   :  { %v1611_v45 = vsel %vm1375_vm7, %v3608_v44, 0.0  ;;  %v1839_v54 = vmul.f32 1.442695, %v1838_v51 }
 0x998   :  { %1612 = vadd.xlane.f32.xlu1 %v1611_v45 }
 0x999   :  { %3050 = vpow2.f32 %v1839_v54 }
 0x99c   :  { %v1949_v52 = vpop.xlane.xlu0 %1948 }
 0x99d   :  { %v1950_v53 = vsub.f32 %v1941_v15, %v1949_v52 }
 0x99e   :  { %v3049_v58 = vpop.eup %3048 }
 0x99f   :  { %v1951_v56 = vmul.f32 1.442695, %v1950_v53 }
 0x9a0   :  { %v1503_v2 = vpop.permute.xlu0 %1502 }
 0x9a1   :  { %3052 = vpow2.f32 %v1951_v56  ;;  %v1508_v17 = vsel %vm1394_vm8, %v1503_v2, 0 }
 0x9a4   :  { %v2064_v46 = vpop.xlane.xlu1 %2063 }
 0x9a5   :  { %v2065_v55 = vsub.f32 %v2056_v21, %v2064_v46 }
 0x9a6   :  { %1617 = vrot.lane.b32.xlu0 %v3512_v19, %s3830_s7  ;;  %v3621_v59 = vpop.eup %3050 }
 0x9a7   :  { %v2066_v57 = vmul.f32 1.442695, %v2065_v55  ;;  %v1841_v61 = vsel %vm1375_vm7, %v3621_v59, 0.0 }
 0x9a8   :  { %v1390_v10 = vpop.permute.xlu1 %1389 }
 0x9a9   :  { %v1396_v48 = vsel %vm1394_vm8, %v1390_v10, 0  ;;  %1732 = vrot.lane.b32.xlu1 %v3512_v19, %s3831_s3  ;;  %3054 = vpow2.f32 %v2066_v57  ;;  %v1726_v19 = vsel %vm1375_vm7, %v3049_v58, 0.0 }
 0x9aa   :  { %2857 = vmatpush3.bf16.msra.mxu1 %v1396_v48 }
 0x9ab   :  { %2868 = vmatprep.subr.bf16.mxu1 %v3082_v0 }
 0x9ae   :  { %v3623_v60 = vpop.eup %3052 }
 0x9af   :  { %v1953_v63 = vsel %vm1375_vm7, %v3623_v60, 0.0 }
 0x9b6   :  { %v3627_v62 = vpop.eup %3054 }
 0x9b7   :  { %v2068_v1 = vsel %vm1375_vm7, %v3627_v62, 0.0 }
 0x9c5   :  { %1727 = vadd.xlane.f32.xlu0 %v1726_v19 }
 0x9c9   :  { %1842 = vadd.xlane.f32.xlu0 %v1841_v61 }
 0x9cd   :  { %1954 = vadd.xlane.f32.xlu1 %v1953_v63  ;;  %2069 = vadd.xlane.f32.xlu0 %v2068_v1 }
 0x9d1   :  { %v2179_v5 = vpop.xlane.xlu0 %2178 }
 0x9d2   :  { %v2180_v14 = vsub.f32 %v3592_v26, %v2179_v5 }
 0x9d4   :  { %v2181_v8 = vmul.f32 1.442695, %v2180_v14 }
 0x9d6   :  { %3056 = vpow2.f32 %v2181_v8 }
 0x9d9   :  { %v1384_v9 = vpop.xlane.xlu1 %1383 }
 0x9da   :  { %3058 = vrcp.f32 %v1384_v9 }
 0x9de   :  { %1959 = vrot.lane.b32.xlu1 %v3534_v32, %s3087_s28  ;;  %s3833_s28 = smov 16  }
 0x9e2   :  { %2074 = vrot.lane.b32.xlu1 %v3534_v32, %s3830_s7 }
 0x9e3   :  { %v3638_v11 = vpop.eup %3056 }
 0x9e4   :  { %v2183_v12 = vsel %vm1375_vm7, %v3638_v11, 0.0 }
 0x9e5   :  { %2184 = vadd.xlane.f32.xlu0 %v2183_v12 }
 0x9e6   :  { %2189 = vrot.lane.b32.xlu1 %v3534_v32, %s3831_s3 }
 0x9e7   :  { %v3059_v13 = vpop.eup %3058 }
 0x9e8   :  { %v1386_v15 = vmul.f32 %v3059_v13, %v3600_v35 }
 0x9ea   :  { %v1387_v16 = vpack.c.bf16 %v1386_v15, %v1386_v15 }
 0x9ec   :  { %2859 = vmatmul.mubr.msk.bf16.vlgmr.msra.gmra.mxu1 %vm1375_vm7, %v1387_v16 }
 0x9ed   :  { %2869 = vmatpush3.bf16.msra.mxu1 %v1508_v17  ;;  %2870 = vmatprep.mubr.msk.bf16.mxu1 %vm3083_vm0, %v3082_v0 }
 0x9ee   :  { %2880 = vmatprep.subr.bf16.mxu1 %v3082_v0 }
 0x9fb   :  { %1847 = vrot.lane.b32.xlu0 %v3534_v32, %s3085_s27  ;;  %s3832_s27 = smov 8  }
 0xa19   :  { %v1498_v18 = vpop.xlane.xlu0 %1497 }
 0xa1a   :  { %3060 = vrcp.f32 %v1498_v18 }
 0xa1d   :  { %v1618_v23 = vpop.permute.xlu0 %1617 }
 0xa1e   :  { %v1623_v25 = vsel %vm1394_vm8, %v1618_v23, 0  ;;  %v2999_v23 = vld [vmem:[%s3790_s10] sm:$0xff]  }
 0xa21   :  { %v1613_v20 = vpop.xlane.xlu1 %1612 }
 0xa22   :  { %3062 = vrcp.f32 %v1613_v20 }
 0xa25   :  { %v1733_v27 = vpop.permute.xlu1 %1732 }
 0xa26   :  { %v1738_v29 = vsel %vm1394_vm8, %v1733_v27, 0 }
 0xa27   :  { %v3061_v21 = vpop.eup %3060 }
 0xa28   :  { %v1500_v22 = vmul.f32 %v3061_v21, %v3604_v42  ;;  %v2998_v21 = vld [vmem:[%s3790_s10 + $0x8] sm:$0xff]  }
 0xa29   :  { %2947 = vmatpush3.bf16.msra.mxu0 %v2998_v21  ;;  %v3005_v21 = vld [vmem:[%s3793_s14] sm:$0xff]  }
 0xa2a   :  { %v1501_v24 = vpack.c.bf16 %v1500_v22, %v1500_v22  ;;  %2948 = vmatprep.subr.bf16.mxu0 %v3082_v0 }
 0xa2c   :  { %2871 = vmatmul.mubr.msk.bf16.vlgmr.msra.gmra.mxu1 %vm1375_vm7, %v1501_v24 }
 0xa2d   :  { %2881 = vmatpush3.bf16.msra.mxu1 %v1623_v25  ;;  %2882 = vmatprep.mubr.msk.bf16.mxu1 %vm3083_vm0, %v3082_v0 }
 0xa2e   :  { %2892 = vmatprep.subr.bf16.mxu1 %v3082_v0  ;;  %2949 = vmatpush3.bf16.msra.mxu0 %v2999_v23 }
 0xa2f   :  { %v3063_v32 = vpop.eup %3062  ;;  %2962 = vmatprep.subr.bf16.mxu0 %v3082_v0 }
 0xa30   :  { %v1615_v26 = vmul.f32 %v3063_v32, %v3608_v44 }
 0xa32   :  { %v1616_v28 = vpack.c.bf16 %v1615_v26, %v1615_v26 }
 0xa34   :  { %2883 = vmatmul.mubr.msk.bf16.vlgmr.msra.gmra.mxu1 %vm1375_vm7, %v1616_v28 }
 0xa35   :  { %2893 = vmatpush3.bf16.msra.mxu1 %v1738_v29  ;;  %2894 = vmatprep.mubr.msk.bf16.mxu1 %vm3083_vm0, %v3082_v0 }
 0xa36   :  { %2904 = vmatprep.subr.bf16.mxu1 %v3082_v0 }
 0xa4e   :  { %v1728_v30 = vpop.xlane.xlu0 %1727 }
 0xa4f   :  { %3064 = vrcp.f32 %v1728_v30 }
 0xa52   :  { %v1843_v34 = vpop.xlane.xlu0 %1842 }
 0xa53   :  { %3066 = vrcp.f32 %v1843_v34 }
 0xa56   :  { %v1955_v36 = vpop.xlane.xlu1 %1954  ;;  %v2070_v37 = vpop.xlane.xlu0 %2069 }
 0xa57   :  { %3068 = vrcp.f32 %v1955_v36 }
 0xa58   :  { %3070 = vrcp.f32 %v2070_v37 }
 0xa5a   :  { %v1960_v42 = vpop.permute.xlu1 %1959 }
 0xa5b   :  { %v1965_v45 = vsel %vm1394_vm8, %v1960_v42, 0 }
 0xa5c   :  { %v3065_v31 = vpop.eup %3064 }
 0xa5d   :  { %v1730_v33 = vmul.f32 %v3065_v31, %v3049_v58 }
 0xa5e   :  { %v2075_v46 = vpop.permute.xlu1 %2074 }
 0xa5f   :  { %v1731_v35 = vpack.c.bf16 %v1730_v33, %v1730_v33  ;;  %v2080_v48 = vsel %vm1394_vm8, %v2075_v46, 0 }
 0xa60   :  { %v3067_v38 = vpop.eup %3066 }
 0xa61   :  { %2895 = vmatmul.mubr.msk.bf16.vlgmr.msra.gmra.mxu1 %vm1375_vm7, %v1731_v35  ;;  %v1845_v40 = vmul.f32 %v3067_v38, %v3621_v59 }
 0xa62   :  { %2906 = vmatprep.mubr.msk.bf16.mxu1 %vm3083_vm0, %v3082_v0  ;;  %v2190_v50 = vpop.permute.xlu1 %2189 }
 0xa63   :  { %v1846_v43 = vpack.c.bf16 %v1845_v40, %v1845_v40  ;;  %v2195_v53 = vsel %vm1394_vm8, %v2190_v50, 0 }
 0xa64   :  { %v3069_v44 = vpop.eup %3068 }
 0xa65   :  { %v1957_v4 = vmul.f32 %v3069_v44, %v3623_v60  ;;  %v3071_v47 = vpop.eup %3070 }
 0xa66   :  { %v2072_v49 = vmul.f32 %v3071_v47, %v3627_v62 }
 0xa67   :  { %v1958_v10 = vpack.c.bf16 %v1957_v4, %v1957_v4 }
 0xa68   :  { %v2073_v51 = vpack.c.bf16 %v2072_v49, %v2072_v49 }
 0xa6e   :  { %v2185_v39 = vpop.xlane.xlu0 %2184 }
 0xa6f   :  { %3072 = vrcp.f32 %v2185_v39 }
 0xa72   :  { %v1848_v3 = vpop.permute.xlu0 %1847 }
 0xa73   :  { %v1853_v41 = vsel %vm1394_vm8, %v1848_v3, 0  ;;  %v2616_v3 = vld [vmem:[%s3791_s11] ss:$0 sm:$0xff] }
 0xa74   :  { %2905 = vmatpush3.bf16.msra.mxu1 %v1853_v41 }
 0xa75   :  { %2916 = vmatprep.subr.bf16.mxu1 %v3082_v0 }
 0xa77   :  { %2907 = vmatmul.mubr.msk.bf16.vlgmr.msra.gmra.mxu1 %vm1375_vm7, %v1846_v43 }
 0xa78   :  { %2917 = vmatpush3.bf16.msra.mxu1 %v1965_v45  ;;  %2918 = vmatprep.mubr.msk.bf16.mxu1 %vm3083_vm0, %v3082_v0 }
 0xa79   :  { %2928 = vmatprep.subr.bf16.mxu1 %v3082_v0 }
 0xa7c   :  { %v3073_v52 = vpop.eup %3072 }
 0xa7d   :  { %v2187_v54 = vmul.f32 %v3073_v52, %v3638_v11 }
 0xa7f   :  { %2919 = vmatmul.mubr.msk.bf16.vlgmr.msra.gmra.mxu1 %vm1375_vm7, %v1958_v10  ;;  %v2188_v55 = vpack.c.bf16 %v2187_v54, %v2187_v54 }
 0xa80   :  { %2929 = vmatpush3.bf16.msra.mxu1 %v2080_v48  ;;  %2930 = vmatprep.mubr.msk.bf16.mxu1 %vm3083_vm0, %v3082_v0 }
 0xa81   :  { %2940 = vmatprep.subr.bf16.mxu1 %v3082_v0 }
 0xa87   :  { %2931 = vmatmul.mubr.msk.bf16.vlgmr.msra.gmra.mxu1 %vm1375_vm7, %v2073_v51 }
 0xa88   :  { %2941 = vmatpush3.bf16.msra.mxu1 %v2195_v53  ;;  %2942 = vmatprep.mubr.msk.bf16.mxu1 %vm3083_vm0, %v3082_v0 }
 0xa89   :  { %2954 = vmatprep.subr.bf16.mxu1 %v3082_v0 }
 0xa8f   :  { %2943 = vmatmul.mubr.msk.bf16.vlgmr.msra.gmra.mxu1 %vm1375_vm7, %v2188_v55 }
 0xa90   :  { %2958 = vmatprep.mubr.msk.bf16.mxu1 %vm3083_vm0, %v3082_v0 }
 0xaac   :  { %v1432_v56 = vpop.f32.mrf.mxu1 }
 0xaad   :  { %1438 = vst.msk [vmem:[#allocation2] sm:$0xff] %vm150_vm2, %v1432_v56 }
 0xaae   :  { %v2860_v57 = vpop.f32.mrf.mxu1 }
 0xab0   :  { %v1435_v58 = vpop.f32.mrf.mxu1 }
 0xab1   :  { %v3001_v58 = vld [vmem:[%s3792_s12] sm:$0xff]  }
 0xab2   :  { %v2861_v19 = vpop.f32.mrf.mxu1 }
 0xab3   :  { %v3002_v19 = vld [vmem:[%s3793_s14 + $0x18] sm:$0xff]  }
 0xaec   :  { %v1544_v59 = vpop.f32.mrf.mxu1 }
 0xaed   :  { %1551 = vrot.lane.b32.xlu1 %v1544_v59, %s3832_s27 }
 0xaee   :  { %v2872_v60 = vpop.f32.mrf.mxu1 }
 0xaf0   :  { %v1547_v61 = vpop.f32.mrf.mxu1 }
 0xaf2   :  { %v2873_v62 = vpop.f32.mrf.mxu1 }
 0xaf4   :  { %v1659_v63 = vpop.f32.mrf.mxu1 }
 0xaf5   :  { %1666 = vrot.lane.b32.xlu0 %v1659_v63, %s3833_s28 }
 0xaf6   :  { %v2884_v1 = vpop.f32.mrf.mxu1 }
 0xaf8   :  { %v1662_v2 = vpop.f32.mrf.mxu1 }
 0xafa   :  { %v2885_v5 = vpop.f32.mrf.mxu1 }
 0xb21   :  { %v1774_v14 = vpop.f32.mrf.mxu1 }
 0xb22   :  { %1781 = vrot.lane.b32.xlu0 %v1774_v14, %s3834_s30  ;;  %v2620_v14 = vld [vmem:[%s3794_s18] ss:$0 sm:$0xff] }
 0xb23   :  { %v2896_v8 = vpop.f32.mrf.mxu1 }
 0xb25   :  { %v1777_v9 = vpop.f32.mrf.mxu1 }
 0xb27   :  { %v2897_v11 = vpop.f32.mrf.mxu1 }
 0xb37   :  { %v1889_v12 = vpop.f32.mrf.mxu1 }
 0xb38   :  { %1895 = vst.msk [vmem:[#allocation2 + $0x8] sm:$0xff] %vm150_vm2, %v1889_v12  ;;  %v2621_v12 = vld [vmem:[%s3795_s19] ss:$0 sm:$0xff] }
 0xb39   :  { %v2908_v13 = vpop.f32.mrf.mxu1 }
 0xb3b   :  { %v1892_v15 = vpop.f32.mrf.mxu1 }
 0xb3d   :  { %v2909_v16 = vpop.f32.mrf.mxu1 }
 0xb3f   :  { %v2001_v17 = vpop.f32.mrf.mxu1 }
 0xb40   :  { %2008 = vrot.lane.b32.xlu1 %v2001_v17, %s3832_s27 }
 0xb41   :  { %v2920_v18 = vpop.f32.mrf.mxu1 }
 0xb42   :  { %v3003_v18 = vld [vmem:[%s3793_s14 + $0x10] sm:$0xff]  }
 0xb43   :  { %v2004_v20 = vpop.f32.mrf.mxu1 }
 0xb44   :  { %v3004_v20 = vld [vmem:[%s3793_s14 + $0x8] sm:$0xff]  }
 0xb45   :  { %v2921_v22 = vpop.f32.mrf.mxu1 }
 0xb46   :  { %v2622_v22 = vld [vmem:[%s3796_s13] ss:$0 sm:$0xff] }
 0xb47   :  { %v2116_v24 = vpop.f32.mrf.mxu1 }
 0xb48   :  { %2123 = vrot.lane.b32.xlu1 %v2116_v24, %s3833_s28 }
 0xb49   :  { %v2932_v25 = vpop.f32.mrf.mxu1 }
 0xb4b   :  { %v2119_v32 = vpop.f32.mrf.mxu1 }
 0xb4d   :  { %v2933_v26 = vpop.f32.mrf.mxu1 }
 0xb4f   :  { %v2231_v27 = vpop.f32.mrf.mxu1 }
 0xb50   :  { %2238 = vrot.lane.b32.xlu1 %v2231_v27, %s3834_s30 }
 0xb51   :  { %v2944_v28 = vpop.f32.mrf.mxu1 }
 0xb53   :  { %v2234_v29 = vpop.f32.mrf.mxu1 }
 0xb55   :  { %v2945_v30 = vpop.f32.mrf.mxu1 }
 0xb5f   :  { %v1552_v31 = vpop.permute.xlu1 %1551 }
 0xb60   :  { %1554 = vst.msk [vmem:[#allocation2] sm:$0xff] %vm373_vm4, %v1552_v31 }
 0xb67   :  { %v1667_v33 = vpop.permute.xlu0 %1666 }
 0xb68   :  { %1669 = vst.msk [vmem:[#allocation2] sm:$0xff] %vm489_vm5, %v1667_v33 }
 0xb94   :  { %v1782_v34 = vpop.permute.xlu0 %1781 }
 0xb95   :  { %1784 = vst.msk [vmem:[#allocation2] sm:$0xff] %vm605_vm6, %v1782_v34 }
 0xb9c   :  { %v2242_v38 = vld [vmem:[#allocation2] sm:$0xff] }
 0xbb2   :  { %v2009_v35 = vpop.permute.xlu1 %2008 }
 0xbb3   :  { %2011 = vst.msk [vmem:[#allocation2 + $0x8] sm:$0xff] %vm373_vm4, %v2009_v35 }
 0xbba   :  { %v2124_v36 = vpop.permute.xlu1 %2123 }
 0xbbb   :  { %2126 = vst.msk [vmem:[#allocation2 + $0x8] sm:$0xff] %vm489_vm5, %v2124_v36 }
 0xbc2   :  { %v2239_v37 = vpop.permute.xlu1 %2238 }
 0xbc3   :  { %2241 = vst.msk [vmem:[#allocation2 + $0x8] sm:$0xff] %vm605_vm6, %v2239_v37 }
 0xbca   :  { %v2243_v39 = vld [vmem:[#allocation2 + $0x8] sm:$0xff] }
 0xbcb   :  { %v2244_v40 = vpack.c.bf16 %v2243_v39, %v2242_v38 }
 0xbcd   :  { %2951 = vmatmul.mubr.msk.bf16.vlgmr.msra.gmra.mxu0 %vm101_vm1, %v2244_v40 }
 0xbce   :  { %2970 = vmatprep.mubr.msk.bf16.mxu0 %vm3083_vm0, %v3082_v0  ;;  %2963 = vmatpush3.bf16.msra.mxu0 %v3002_v19 }
 0xbcf   :  { %2964 = vmatprep.subr.bf16.mxu0 %v3082_v0 }
 0xbd2   :  { %2965 = vmatpush3.bf16.msra.mxu0 %v3003_v18 }
 0xbd3   :  { %2966 = vmatprep.subr.bf16.mxu0 %v3082_v0 }
 0xbd6   :  { %2967 = vmatpush3.bf16.msra.mxu0 %v3004_v20 }
 0xbd7   :  { %2968 = vmatprep.subr.bf16.mxu0 %v3082_v0 }
 0xbda   :  { %2969 = vmatpush3.bf16.msra.mxu0 %v3005_v21 }
 0xc8d   :  { %v2305_v41 = vpop.f32.mrf.mxu0 }
 0xc8e   :  { %v2306_v42 = vadd.f32 %v2616_v3, %v2305_v41 }
 0xc8f   :  { %v2952_v43 = vpop.f32.mrf.mxu0 }
 0xc90   :  { %v2312_v44 = vadd.f32 %v2306_v42, %v3500_v6 }
 0xc91   :  { %v2308_v45 = vpop.f32.mrf.mxu0 }
 0xc92   :  { %v2309_v4 = vadd.f32 %v2616_v3, %v2308_v45  ;;  %v2314_v46 = vsel %vm101_vm1, %v2312_v44, 0.0 }
 0xc93   :  { %2315 = vadd.xlane.f32.xlu0 %v2314_v46  ;;  %v2953_v10 = vpop.f32.mrf.mxu0 }
 0xc94   :  { %v2313_v47 = vadd.f32 %v2309_v4, %v3502_v7  ;;  %v3000_v7 = vld [vmem:[%s3792_s12 + $0x8] sm:$0xff]  }
 0xc95   :  { %2955 = vmatpush3.bf16.msra.mxu1 %v3000_v7 }
 0xc96   :  { %v2317_v48 = vsel %vm101_vm1, %v2313_v47, 0.0  ;;  %2956 = vmatprep.subr.bf16.mxu1 %v3082_v0  ;;  %v2626_v0 = vld [vmem:[%s3797_s15] ss:$0 sm:$0xff] }
 0xc97   :  { %2318 = vadd.xlane.f32.xlu1 %v2317_v48 }
 0xc99   :  { %2957 = vmatpush3.bf16.msra.mxu1 %v3001_v58 }
 0xd1c   :  { %v2316_v49 = vpop.xlane.xlu0 %2315 }
 0xd1d   :  { %v2320_v50 = vmul.f32 0.03125, %v2316_v49 }
 0xd1f   :  { %v2322_v51 = vsub.f32 %v2312_v44, %v2320_v50 }
 0xd20   :  { %v2319_v52 = vpop.xlane.xlu1 %2318 }
 0xd21   :  { %v2321_v53 = vmul.f32 0.03125, %v2319_v52  ;;  %v2324_v54 = vmul.f32 %v2322_v51, %v2322_v51 }
 0xd23   :  { %v2323_v55 = vsub.f32 %v2313_v47, %v2321_v53  ;;  %v2326_v6 = vsel %vm101_vm1, %v2324_v54, 0.0 }
 0xd24   :  { %2327 = vadd.xlane.f32.xlu0 %v2326_v6  ;;  %v2632_v6 = vld [vmem:[%s3798_s20] ss:$0 sm:$0xff] }
 0xd25   :  { %v2325_v56 = vmul.f32 %v2323_v55, %v2323_v55 }
 0xd27   :  { %v2329_v57 = vsel %vm101_vm1, %v2325_v56, 0.0 }
 0xd28   :  { %2330 = vadd.xlane.f32.xlu0 %v2329_v57  ;;  %v2633_v57 = vld [vmem:[%s3799_s21] ss:$0 sm:$0xff] }
 0xdad   :  { %v2328_v59 = vpop.xlane.xlu0 %2327 }
 0xdae   :  { %v2332_v60 = vmul.f32 0.03125, %v2328_v59 }
 0xdb0   :  { %v2334_v61 = vadd.f32 1e-05, %v2332_v60 }
 0xdb1   :  { %v2331_v62 = vpop.xlane.xlu0 %2330 }
 0xdb2   :  { %3074 = vrsqrt.f32 %v2334_v61  ;;  %v2333_v63 = vmul.f32 0.03125, %v2331_v62 }
 0xdb4   :  { %v2335_v1 = vadd.f32 1e-05, %v2333_v63 }
 0xdb6   :  { %3076 = vrsqrt.f32 %v2335_v1 }
 0xdbf   :  { %v3075_v2 = vpop.eup %3074 }
 0xdc0   :  { %v2338_v5 = vmul.f32 %v3075_v2, %v2322_v51 }
 0xdc2   :  { %v2347_v11 = vmul.f32 %v2620_v14, %v2338_v5 }
 0xdc3   :  { %v3077_v8 = vpop.eup %3076 }
 0xdc4   :  { %v2339_v9 = vmul.f32 %v3077_v8, %v2323_v55  ;;  %v2356_v15 = vadd.f32 %v2621_v12, %v2347_v11 }
 0xdc6   :  { %v2348_v13 = vmul.f32 %v2620_v14, %v2339_v9 }
 0xdc8   :  { %v2357_v16 = vadd.f32 %v2621_v12, %v2348_v13 }
 0xdca   :  { %v2358_v17 = vpack.c.bf16 %v2357_v16, %v2356_v15 }
 0xdcc   :  { %2959 = vmatmul.mubr.msk.bf16.vlgmr.msra.gmra.mxu1 %vm101_vm1, %v2358_v17 }
 0xe8c   :  { %v2419_v23 = vpop.f32.mrf.mxu1 }
 0xe8d   :  { %v2420_v25 = vadd.f32 %v2622_v22, %v2419_v23 }
 0xe8e   :  { %v2960_v24 = vpop.f32.mrf.mxu1 }
 0xe8f   :  { %v2426_v28 = vmax.f32 %v2420_v25, 0.0 }
 0xe90   :  { %v2422_v32 = vpop.f32.mrf.mxu1 }
 0xe91   :  { %v2423_v26 = vadd.f32 %v2622_v22, %v2422_v32 }
 0xe92   :  { %v2961_v27 = vpop.f32.mrf.mxu1 }
 0xe93   :  { %v2427_v29 = vmax.f32 %v2423_v26, 0.0 }
 0xe95   :  { %v2428_v30 = vpack.c.bf16 %v2427_v29, %v2426_v28 }
 0xe97   :  { %2971 = vmatmul.mubr.msk.bf16.vlgmr.msra.gmra.mxu0 %vm2468_vm9, %v2428_v30 }
 0xf57   :  { %v2506_v31 = vpop.f32.mrf.mxu0 }
 0xf58   :  { %v2507_v33 = vadd.f32 %v2626_v0, %v2506_v31 }
 0xf59   :  { %v2972_v34 = vpop.f32.mrf.mxu0 }
 0xf5a   :  { %v2513_v35 = vadd.f32 %v2507_v33, %v2356_v15 }
 0xf5b   :  { %v2509_v36 = vpop.f32.mrf.mxu0 }
 0xf5c   :  { %v2510_v37 = vadd.f32 %v2626_v0, %v2509_v36  ;;  %v2515_v38 = vsel %vm101_vm1, %v2513_v35, 0.0 }
 0xf5d   :  { %2516 = vadd.xlane.f32.xlu1 %v2515_v38  ;;  %v2973_v39 = vpop.f32.mrf.mxu0 }
 0xf5e   :  { %v2514_v40 = vadd.f32 %v2510_v37, %v2357_v16 }
 0xf60   :  { %v2518_v3 = vsel %vm101_vm1, %v2514_v40, 0.0 }
 0xf61   :  { %2519 = vadd.xlane.f32.xlu0 %v2518_v3 }
 0xfe6   :  { %v2517_v41 = vpop.xlane.xlu1 %2516 }
 0xfe7   :  { %v2521_v42 = vmul.f32 0.03125, %v2517_v41 }
 0xfe9   :  { %v2523_v43 = vsub.f32 %v2513_v35, %v2521_v42 }
 0xfea   :  { %v2520_v44 = vpop.xlane.xlu0 %2519 }
 0xfeb   :  { %v2522_v45 = vmul.f32 0.03125, %v2520_v44  ;;  %v2525_v4 = vmul.f32 %v2523_v43, %v2523_v43 }
 0xfed   :  { %v2524_v46 = vsub.f32 %v2514_v40, %v2522_v45  ;;  %v2527_v10 = vsel %vm101_vm1, %v2525_v4, 0.0 }
 0xfee   :  { %2528 = vadd.xlane.f32.xlu1 %v2527_v10 }
 0xfef   :  { %v2526_v47 = vmul.f32 %v2524_v46, %v2524_v46 }
 0xff1   :  { %v2530_v48 = vsel %vm101_vm1, %v2526_v47, 0.0 }
 0xff2   :  { %2531 = vadd.xlane.f32.xlu0 %v2530_v48 }
0x1077   :  { %v2529_v49 = vpop.xlane.xlu1 %2528 }
0x1078   :  { %v2533_v50 = vmul.f32 0.03125, %v2529_v49 }
0x107a   :  { %v2535_v51 = vadd.f32 1e-05, %v2533_v50 }
0x107b   :  { %v2532_v52 = vpop.xlane.xlu0 %2531 }
0x107c   :  { %3078 = vrsqrt.f32 %v2535_v51  ;;  %v2534_v53 = vmul.f32 0.03125, %v2532_v52 }
0x107e   :  { %v2536_v54 = vadd.f32 1e-05, %v2534_v53 }
0x1080   :  { %3080 = vrsqrt.f32 %v2536_v54 }
0x1089   :  { %v3079_v55 = vpop.eup %3078 }
0x108a   :  { %v2539_v56 = vmul.f32 %v3079_v55, %v2523_v43 }
0x108c   :  { %v2548_v7 = vmul.f32 %v2632_v6, %v2539_v56 }
0x108d   :  { %v3081_v58 = vpop.eup %3080 }
0x108e   :  { %v2557_v19 = vadd.f32 %v2633_v57, %v2548_v7  ;;  %v2540_v59 = vmul.f32 %v3081_v58, %v2524_v46 }
0x1090   :  { %2559 = vst.msk [vmem:[%s3800_s22] sm:$0xff] %vm101_vm1, %v2557_v19  ;;  %v2549_v60 = vmul.f32 %v2632_v6, %v2540_v59 }
0x1092   :  { %v2558_v61 = vadd.f32 %v2633_v57, %v2549_v60 }
0x1094   :  { %2560 = vst.msk [vmem:[%s3800_s22 + $0x8] sm:$0xff] %vm101_vm1, %v2558_v61 }

</bundles_post_ra>
